<compile_context>
chip_gen: v7x
topology: tpu7x:2x2x1
jax: 0.10.0
libtpu: 0.0.40
codegen_flags: <defaults>
</compile_context>

<pallas_src>
import functools

import jax
import jax.numpy as jnp
from jax.experimental import pallas as pl
from jax.experimental.pallas import tpu as pltpu

NEG_SLOPE = 0.01  # F.leaky_relu default negative_slope

D_IN, D_H1, D_H2, D_OUT = 768, 512, 512, 256


def _leaky_relu(v):
    return jnp.where(v > 0, v, NEG_SLOPE * v)


def _round_up(v, m):
    return ((v + m - 1) // m) * m


def shared_encoder_kernel(x_ref, w1_ref, b1_ref, w2_ref, b2_ref, w3_ref, b3_ref, o_ref):
    # All three Linear+LeakyReLU layers fused in one kernel invocation per batch tile.
    # Matmuls run in bf16 on the MXU with f32 accumulation; bias + activation in f32.
    x = x_ref[...].astype(jnp.bfloat16)
    h = _leaky_relu(
        jnp.dot(x, w1_ref[...], preferred_element_type=jnp.float32) + b1_ref[...]
    )
    h = _leaky_relu(
        jnp.dot(h.astype(jnp.bfloat16), w2_ref[...], preferred_element_type=jnp.float32)
        + b2_ref[...]
    )
    y = _leaky_relu(
        jnp.dot(h.astype(jnp.bfloat16), w3_ref[...], preferred_element_type=jnp.float32)
        + b3_ref[...]
    )
    o_ref[...] = y.astype(o_ref.dtype)


@functools.partial(jax.jit, static_argnames=("tm",))
def shared_encoder(x, params, *, tm=256):
    """x: [B, 768] float32 -> [B, 256] float32.

    tm: batch tile (rows per grid step).  Default 256 = native MXU tile on v6e/v7x
    (multiple of 128 for v5e).  For tm >= 512 the fused intermediates should be
    chunked; keep tm <= 512.
    """
    w1, b1, w2, b2, w3, b3 = params
    B = x.shape[0]
    # Shrink the tile for tiny batches (keep the sublane multiple-of-8 constraint);
    # Pallas masks the ragged last block, so no host-side padding is needed.
    tm_eff = min(tm, _round_up(B, 8))
    grid = (pl.cdiv(B, tm_eff),)

    full = lambda i: (0, 0)
    out = pl.pallas_call(
        shared_encoder_kernel,
        out_shape=jax.ShapeDtypeStruct((B, D_OUT), jnp.float32),
        grid_spec=pltpu.PrefetchScalarGridSpec(
            num_scalar_prefetch=0,
            grid=grid,
            in_specs=[
                pl.BlockSpec((tm_eff, D_IN), lambda i: (i, 0)),  # x tile (pipelined)
                pl.BlockSpec((D_IN, D_H1), full),                # W1 (resident, bf16)
                pl.BlockSpec((1, D_H1), full),                   # b1
                pl.BlockSpec((D_H1, D_H2), full),                # W2 (resident, bf16)
                pl.BlockSpec((1, D_H2), full),                   # b2
                pl.BlockSpec((D_H2, D_OUT), full),               # W3 (resident, bf16)
                pl.BlockSpec((1, D_OUT), full),                  # b3
            ],
            out_specs=pl.BlockSpec((tm_eff, D_OUT), lambda i: (i, 0)),
        ),
        compiler_params=pltpu.CompilerParams(
            dimension_semantics=("parallel",),   # batch tiles shard across TCs (v7x megacore)
            vmem_limit_bytes=32 * 1024 * 1024,
        ),
    )(x, w1, b1, w2, b2, w3, b3)

    return out


def init_params(key):
    """Deterministic init mimicking PyTorch nn.Linear default U(-1/sqrt(fan_in), +1/sqrt(fan_in)).

    Weights are stored as bf16 [in, out]; biases as f32 [1, out].
    """
    ks = jax.random.split(key, 6)

    def linear(kw, kb, fan_in, fan_out):
        bound = 1.0 / jnp.sqrt(fan_in)
        w = jax.random.uniform(kw, (fan_in, fan_out), jnp.float32, -bound, bound)
        b = jax.random.uniform(kb, (1, fan_out), jnp.float32, -bound, bound)
        return w.astype(jnp.bfloat16), b

    w1, b1 = linear(ks[0], ks[1], D_IN, D_H1)
    w2, b2 = linear(ks[2], ks[3], D_H1, D_H2)
    w3, b3 = linear(ks[4], ks[5], D_H2, D_OUT)
    return (w1, b1, w2, b2, w3, b3)


def reference(x, params):
    # Same bf16-matmul / f32-accumulate math as the kernel, expressed in plain JAX.
    w1, b1, w2, b2, w3, b3 = params

    def lrelu(v):
        return jnp.where(v > 0, v, NEG_SLOPE * v)

    h = lrelu(jnp.dot(x.astype(jnp.bfloat16), w1, preferred_element_type=jnp.float32) + b1)
    h = lrelu(jnp.dot(h.astype(jnp.bfloat16), w2, preferred_element_type=jnp.float32) + b2)
    return lrelu(jnp.dot(h.astype(jnp.bfloat16), w3, preferred_element_type=jnp.float32) + b3)


if __name__ == "__main__":
    key = jax.random.PRNGKey(0)
    k_x, k_p = jax.random.split(key)
    params = init_params(k_p)

    # Small batch (single tile).
    B = 8
    x = jax.random.normal(k_x, (B, D_IN), jnp.float32)
    y = jax.block_until_ready(shared_encoder(x, params))
    y_ref = reference(x, params)
    assert y.shape == (B, D_OUT), y.shape
    assert jnp.allclose(y, y_ref, atol=1e-2, rtol=1e-2), "mismatch vs reference (B=8)"

    # Ragged batch (exercises the masked partial last block, no host-side padding).
    B2 = 10
    x2 = jax.random.normal(k_x, (B2, D_IN), jnp.float32)
    y2 = jax.block_until_ready(shared_encoder(x2, params))
    y2_ref = reference(x2, params)
    assert y2.shape == (B2, D_OUT), y2.shape
    assert jnp.allclose(y2, y2_ref, atol=1e-2, rtol=1e-2), "mismatch vs reference (B=10)"

    print("KERNEL_OK")
</pallas_src>

<mosaic_0001>
module attributes {stable_mosaic.version = 11 : i64} {
  func.func @shared_encoder_kernel(%arg0: i32, %arg1: memref<8x768xf32, #tpu.memory_space<vmem>>, %arg2: memref<768x512xbf16, #tpu.memory_space<vmem>>, %arg3: memref<1x512xf32, #tpu.memory_space<vmem>>, %arg4: memref<512x512xbf16, #tpu.memory_space<vmem>>, %arg5: memref<1x512xf32, #tpu.memory_space<vmem>>, %arg6: memref<512x256xbf16, #tpu.memory_space<vmem>>, %arg7: memref<1x256xf32, #tpu.memory_space<vmem>>, %arg8: memref<8x256xf32, #tpu.memory_space<vmem>>) attributes {dimension_semantics = [#tpu.dimension_semantics<parallel>], iteration_bounds = array<i64: 1>, scalar_prefetch = 0 : i64, scratch_operands = 0 : i64, tpu.core_type = #tpu.core_type<tc>, window_params = [{transform_indices = @transform_0, window_bounds = array<i64: 8, 768>}, {pipeline_mode = #tpu.pipeline_mode<synchronous>, transform_indices = @transform_1, window_bounds = array<i64: 768, 512>}, {pipeline_mode = #tpu.pipeline_mode<synchronous>, transform_indices = @transform_2, window_bounds = array<i64: 1, 512>}, {pipeline_mode = #tpu.pipeline_mode<synchronous>, transform_indices = @transform_3, window_bounds = array<i64: 512, 512>}, {pipeline_mode = #tpu.pipeline_mode<synchronous>, transform_indices = @transform_4, window_bounds = array<i64: 1, 512>}, {pipeline_mode = #tpu.pipeline_mode<synchronous>, transform_indices = @transform_5, window_bounds = array<i64: 512, 256>}, {pipeline_mode = #tpu.pipeline_mode<synchronous>, transform_indices = @transform_6, window_bounds = array<i64: 1, 256>}, {transform_indices = @transform_7, window_bounds = array<i64: 8, 256>}]} {
    %c0 = arith.constant 0 : index
    %c0_0 = arith.constant 0 : index
    %0 = vector.load %arg1[%c0, %c0_0] : memref<8x768xf32, #tpu.memory_space<vmem>>, vector<8x768xf32>
    %1 = arith.truncf %0 : vector<8x768xf32> to vector<8x768xbf16>
    %c0_1 = arith.constant 0 : index
    %c0_2 = arith.constant 0 : index
    %2 = vector.load %arg2[%c0_1, %c0_2] : memref<768x512xbf16, #tpu.memory_space<vmem>>, vector<768x512xbf16>
    %cst = arith.constant dense<0.000000e+00> : vector<8x512xf32>
    %3 = tpu.matmul %1, %2, %cst {dimension_numbers = #tpu.dot_dimension_numbers<[1], [0], [0], [1], [0, 0, 1, 1], [], []>} : vector<8x768xbf16>, vector<768x512xbf16>, vector<8x512xf32> -> vector<8x512xf32>
    %c0_3 = arith.constant 0 : index
    %c0_4 = arith.constant 0 : index
    %4 = vector.load %arg3[%c0_3, %c0_4] : memref<1x512xf32, #tpu.memory_space<vmem>>, vector<1x512xf32>
    %5 = vector.broadcast %4 : vector<1x512xf32> to vector<8x512xf32>
    %6 = arith.addf %3, %5 : vector<8x512xf32>
    %cst_5 = arith.constant 0.000000e+00 : f32
    %7 = vector.broadcast %cst_5 : f32 to vector<8x512xf32>
    %8 = arith.cmpf ogt, %6, %7 : vector<8x512xf32>
    %cst_6 = arith.constant 0.00999999977 : f32
    %9 = vector.broadcast %cst_6 : f32 to vector<8x512xf32>
    %10 = arith.mulf %9, %6 : vector<8x512xf32>
    %11 = arith.select %8, %6, %10 : vector<8x512xi1>, vector<8x512xf32>
    %12 = arith.truncf %11 : vector<8x512xf32> to vector<8x512xbf16>
    %c0_7 = arith.constant 0 : index
    %c0_8 = arith.constant 0 : index
    %13 = vector.load %arg4[%c0_7, %c0_8] : memref<512x512xbf16, #tpu.memory_space<vmem>>, vector<512x512xbf16>
    %cst_9 = arith.constant dense<0.000000e+00> : vector<8x512xf32>
    %14 = tpu.matmul %12, %13, %cst_9 {dimension_numbers = #tpu.dot_dimension_numbers<[1], [0], [0], [1], [0, 0, 1, 1], [], []>} : vector<8x512xbf16>, vector<512x512xbf16>, vector<8x512xf32> -> vector<8x512xf32>
    %c0_10 = arith.constant 0 : index
    %c0_11 = arith.constant 0 : index
    %15 = vector.load %arg5[%c0_10, %c0_11] : memref<1x512xf32, #tpu.memory_space<vmem>>, vector<1x512xf32>
    %16 = vector.broadcast %15 : vector<1x512xf32> to vector<8x512xf32>
    %17 = arith.addf %14, %16 : vector<8x512xf32>
    %cst_12 = arith.constant 0.000000e+00 : f32
    %18 = vector.broadcast %cst_12 : f32 to vector<8x512xf32>
    %19 = arith.cmpf ogt, %17, %18 : vector<8x512xf32>
    %cst_13 = arith.constant 0.00999999977 : f32
    %20 = vector.broadcast %cst_13 : f32 to vector<8x512xf32>
    %21 = arith.mulf %20, %17 : vector<8x512xf32>
    %22 = arith.select %19, %17, %21 : vector<8x512xi1>, vector<8x512xf32>
    %23 = arith.truncf %22 : vector<8x512xf32> to vector<8x512xbf16>
    %c0_14 = arith.constant 0 : index
    %c0_15 = arith.constant 0 : index
    %24 = vector.load %arg6[%c0_14, %c0_15] : memref<512x256xbf16, #tpu.memory_space<vmem>>, vector<512x256xbf16>
    %cst_16 = arith.constant dense<0.000000e+00> : vector<8x256xf32>
    %25 = tpu.matmul %23, %24, %cst_16 {dimension_numbers = #tpu.dot_dimension_numbers<[1], [0], [0], [1], [0, 0, 1, 1], [], []>} : vector<8x512xbf16>, vector<512x256xbf16>, vector<8x256xf32> -> vector<8x256xf32>
    %c0_17 = arith.constant 0 : index
    %c0_18 = arith.constant 0 : index
    %26 = vector.load %arg7[%c0_17, %c0_18] : memref<1x256xf32, #tpu.memory_space<vmem>>, vector<1x256xf32>
    %27 = vector.broadcast %26 : vector<1x256xf32> to vector<8x256xf32>
    %28 = arith.addf %25, %27 : vector<8x256xf32>
    %cst_19 = arith.constant 0.000000e+00 : f32
    %29 = vector.broadcast %cst_19 : f32 to vector<8x256xf32>
    %30 = arith.cmpf ogt, %28, %29 : vector<8x256xf32>
    %cst_20 = arith.constant 0.00999999977 : f32
    %31 = vector.broadcast %cst_20 : f32 to vector<8x256xf32>
    %32 = arith.mulf %31, %28 : vector<8x256xf32>
    %33 = arith.select %30, %28, %32 : vector<8x256xi1>, vector<8x256xf32>
    %c0_21 = arith.constant 0 : index
    %c0_22 = arith.constant 0 : index
    %34 = vector.load %arg8[%c0_21, %c0_22] : memref<8x256xf32, #tpu.memory_space<vmem>>, vector<8x256xf32>
    tpu.vector_store %arg8[%c0_21, %c0_22], %33 {strides = array<i32>} : memref<8x256xf32, #tpu.memory_space<vmem>>, vector<8x256xf32>,
    return
  }
  func.func @transform_0(%arg0: i32) -> (i32, i32) {
    %c0_i32 = arith.constant 0 : i32
    %c0_i32_0 = arith.constant 0 : i32
    return %arg0, %c0_i32 : i32, i32
  }
  func.func @transform_1(%arg0: i32) -> (i32, i32) {
    %c0_i32 = arith.constant 0 : i32
    %c0_i32_0 = arith.constant 0 : i32
    %c0_i32_1 = arith.constant 0 : i32
    return %c0_i32, %c0_i32_0 : i32, i32
  }
  func.func @transform_2(%arg0: i32) -> (i32, i32) {
    %c0_i32 = arith.constant 0 : i32
    %c0_i32_0 = arith.constant 0 : i32
    %c0_i32_1 = arith.constant 0 : i32
    return %c0_i32, %c0_i32_0 : i32, i32
  }
  func.func @transform_3(%arg0: i32) -> (i32, i32) {
    %c0_i32 = arith.constant 0 : i32
    %c0_i32_0 = arith.constant 0 : i32
    %c0_i32_1 = arith.constant 0 : i32
    return %c0_i32, %c0_i32_0 : i32, i32
  }
  func.func @transform_4(%arg0: i32) -> (i32, i32) {
    %c0_i32 = arith.constant 0 : i32
    %c0_i32_0 = arith.constant 0 : i32
    %c0_i32_1 = arith.constant 0 : i32
    return %c0_i32, %c0_i32_0 : i32, i32
  }
  func.func @transform_5(%arg0: i32) -> (i32, i32) {
    %c0_i32 = arith.constant 0 : i32
    %c0_i32_0 = arith.constant 0 : i32
    %c0_i32_1 = arith.constant 0 : i32
    return %c0_i32, %c0_i32_0 : i32, i32
  }
  func.func @transform_6(%arg0: i32) -> (i32, i32) {
    %c0_i32 = arith.constant 0 : i32
    %c0_i32_0 = arith.constant 0 : i32
    %c0_i32_1 = arith.constant 0 : i32
    return %c0_i32, %c0_i32_0 : i32, i32
  }
  func.func @transform_7(%arg0: i32) -> (i32, i32) {
    %c0_i32 = arith.constant 0 : i32
    %c0_i32_0 = arith.constant 0 : i32
    return %arg0, %c0_i32 : i32, i32
  }
}

</mosaic_0001>

<bundles_post_ra>
// kernel: shared_encoder.1
= control target key start
LH: loop header
LB: loop body
LE: loop exit
PB: predicated region body
PF: predicated region fallthrough
CT: control target
= control target key end

     0   :  { %12 = vsyncpa [#allocation3], 0  ;;  %s4311_s0 = inlined_call_operand.hbm [shape: f32[8,768], index: 0, kind: input, shape index: {}]   ;;  %s4312_s1 = inlined_call_operand.hbm [shape: bf16[768,512], index: 1, kind: input, shape index: {}]   ;;  %s4313_s2 = inlined_call_operand.vmem [shape: f32[1,512], index: 2, kind: input, shape index: {}]   ;;  %s4314_s3 = inlined_call_operand.hbm [shape: bf16[512,512], index: 3, kind: input, shape index: {}]   ;;  %s4315_s4 = inlined_call_operand.vmem [shape: f32[1,512], index: 4, kind: input, shape index: {}]   ;;  %s4316_s5 = inlined_call_operand.hbm [shape: bf16[512,256], index: 5, kind: input, shape index: {}]   ;;  %s4317_s6 = inlined_call_operand.vmem [shape: f32[1,256], index: 6, kind: input, shape index: {}]   ;;  %s4318_s7 = inlined_call_operand.hbm [shape: f32[8,256], index: 7, kind: output, shape index: {}]  }
   0x1   :  { %13 = vsyncpa [#allocation6], 0 }
   0x2   :  { %14 = vsyncpa [#allocation9], 0 }
   0x3   :  { %15 = vsyncpa [#allocation4], 0  ;;  %s4124_s24 = smov [#allocation5]   ;;  %s4006_s28 = scalar_lea.hbm %s4312_s1, 24576 }
   0x4   :  { %s31_s25 = sshll.u32 %s4124_s24, 4  ;;  %p4007_p0 = scmp.ne.s32.totalorder %s4312_s1, %s4006_s28  ;;  %s32_s25 = int_to_ptr.vmem [resolvable:$true] %s31_s25 }
   0x5   :  { %p4010_p1 = scmp.lt.u32.totalorder %s4006_s28, %s4312_s1 }
   0x7   :  { %p4012_p2 = pnand %p4010_p1, %p4007_p0 }
   0x9   :  { %4015 = shalt.err (!%p4012_p2)
}
   0xa   :  { %s4016_s10 = scalar_lea.vmem %s32_s25, 24576  ;;  %p4021_p4 = scmp.lt.s32.totalorder %s32_s25, %s32_s25 }
   0xb   :  { %p4017_p3 = scmp.ne.s32.totalorder %s32_s25, %s4016_s10  ;;  %p4022_p5 = scmp.lt.s32.totalorder %s4016_s10, %s4016_s10 }
   0xd   :  { %p4023_p6 = por %p4022_p5, %p4021_p4 }
   0xf   :  { %p4024_p7 = pnand %p4023_p6, %p4017_p3 }
  0x11   :  { %4027 = shalt.err (!%p4024_p7)
}
  0x12   :  { %s4125_s11 = smov 256   ;;  %s4126_s12 = smov 16  }
  0x13   :  { %37 = dma.hbm_to_vmem [thread:$0]  %s4312_s1, 24576, %s32_s25, [#allocation6], %s4125_s11, %s4125_s11, %s4126_s12  }
  0x14   :  { %s4127_s15 = smov [#allocation2]   ;;  %s4128_s17 = smov [#allocation7]  }
  0x15   :  { %s22_s16 = sshll.u32 %s4127_s15, 4  ;;  %s45_s18 = sshll.u32 %s4128_s17, 4  ;;  %s23_s16 = int_to_ptr.vmem [resolvable:$true] %s22_s16  ;;  %s46_s18 = int_to_ptr.vmem [resolvable:$true] %s45_s18 }
  0x16   :  { %s4028_s21 = scalar_lea.hbm %s4311_s0, 768 }
  0x17   :  { %p4029_p8 = scmp.ne.s32.totalorder %s4311_s0, %s4028_s21  ;;  %p4032_p9 = scmp.lt.u32.totalorder %s4028_s21, %s4311_s0 }
  0x19   :  { %p4034_p10 = pnand %p4032_p9, %p4029_p8 }
  0x1b   :  { %4037 = shalt.err (!%p4034_p10)
}
  0x1c   :  { %s4038_s1 = scalar_lea.vmem %s23_s16, 768  ;;  %p4043_p12 = scmp.lt.s32.totalorder %s23_s16, %s23_s16 }
  0x1d   :  { %p4039_p11 = scmp.ne.s32.totalorder %s23_s16, %s4038_s1  ;;  %p4044_p13 = scmp.lt.s32.totalorder %s4038_s1, %s4038_s1 }
  0x1f   :  { %p4045_p0 = por %p4044_p13, %p4043_p12 }
  0x21   :  { %p4046_p1 = pnand %p4045_p0, %p4039_p11 }
  0x23   :  { %4049 = shalt.err (!%p4046_p1)
}
  0x24   :  { %25 = dma.hbm_to_vmem [thread:$0]  %s4311_s0, 768, %s23_s16, [#allocation3]  }
  0x25   :  { %s4050_s30 = scalar_lea.hbm %s4314_s3, 16384 }
  0x26   :  { %p4051_p2 = scmp.ne.s32.totalorder %s4314_s3, %s4050_s30  ;;  %p4054_p3 = scmp.lt.u32.totalorder %s4050_s30, %s4314_s3 }
  0x28   :  { %p4056_p4 = pnand %p4054_p3, %p4051_p2 }
  0x2a   :  { %4059 = shalt.err (!%p4056_p4)
}
  0x2b   :  { %s4060_s14 = scalar_lea.vmem %s46_s18, 16384  ;;  %p4065_p6 = scmp.lt.s32.totalorder %s46_s18, %s46_s18 }
  0x2c   :  { %p4061_p5 = scmp.ne.s32.totalorder %s46_s18, %s4060_s14  ;;  %p4066_p7 = scmp.lt.s32.totalorder %s4060_s14, %s4060_s14 }
  0x2e   :  { %p4067_p8 = por %p4066_p7, %p4065_p6 }
  0x30   :  { %p4068_p9 = pnand %p4067_p8, %p4061_p5 }
  0x32   :  { %4071 = shalt.err (!%p4068_p9)
}
  0x33   :  { %51 = dma.hbm_to_vmem [thread:$0]  %s4314_s3, 16384, %s46_s18, [#allocation6], %s4125_s11, %s4125_s11, %s4126_s12  }
  0x34   :  { %s4129_s16 = smov [#allocation8]   ;;  %s4072_s21 = scalar_lea.hbm %s4316_s5, 8192 }
  0x35   :  { %s59_s17 = sshll.u32 %s4129_s16, 4  ;;  %p4073_p10 = scmp.ne.s32.totalorder %s4316_s5, %s4072_s21  ;;  %s60_s17 = int_to_ptr.vmem [resolvable:$true] %s59_s17 }
  0x36   :  { %p4076_p11 = scmp.lt.u32.totalorder %s4072_s21, %s4316_s5 }
  0x38   :  { %p4078_p12 = pnand %p4076_p11, %p4073_p10 }
  0x3a   :  { %4081 = shalt.err (!%p4078_p12)
}
  0x3b   :  { %s4082_s1 = scalar_lea.vmem %s60_s17, 8192  ;;  %p4087_p0 = scmp.lt.s32.totalorder %s60_s17, %s60_s17 }
  0x3c   :  { %p4083_p13 = scmp.ne.s32.totalorder %s60_s17, %s4082_s1  ;;  %p4088_p1 = scmp.lt.s32.totalorder %s4082_s1, %s4082_s1 }
  0x3e   :  { %p4089_p2 = por %p4088_p1, %p4087_p0 }
  0x40   :  { %p4090_p3 = pnand %p4089_p2, %p4083_p13 }
  0x42   :  { %4093 = shalt.err (!%p4090_p3)
}
  0x43   :  { %s4130_s3 = smov 128   ;;  %s4131_s11 = smov 8  }
  0x44   :  { %65 = dma.hbm_to_vmem [thread:$0]  %s4316_s5, 8192, %s60_s17, [#allocation9], %s4130_s3, %s4130_s3, %s4131_s11  }
  0x45   :  { %4116 = dma.done.wait [#allocation3], 768  }
  0x46   :  { %4117 = vsyncadd [#allocation3], 4294966528 }
  0x47   :  { %4118 = dma.done.wait [#allocation6], 40960  }
  0x48   :  { %4119 = vsyncadd [#allocation6], 4294926336 }
  0x49   :  { %4120 = dma.done.wait [#allocation9], 8192  }
  0x4a   :  { %4121 = vsyncadd [#allocation9], 4294959104  ;;  %v3430_v0 = vld [vmem:[#allocation5 + $0x4] ss:$16 sps:$4 sm:$0xff]   ;;  %v3434_v2 = vld [vmem:[#allocation5] ss:$16 sps:$4 sm:$0xff]  }
  0x4b   :  { %v3432_v1 = vld [vmem:[#allocation5 + $0x204] ss:$16 sps:$4 sm:$0xff]   ;;  %1266 = vmatprep.subr.bf16.mxu1 %v3430_v0  ;;  %v3435_v3 = vld [vmem:[#allocation5 + $0x200] ss:$16 sps:$4 sm:$0xff]   ;;  %v81_v46 = vld [vmem:[#allocation2 + $0x8] sm:$0xff]  ;;  %s4132_s29 = smov [#allocation10]  }
  0x4c   :  { %1307 = vmatprep.subr.bf16.mxu0 %v3432_v1  ;;  %v3436_v4 = vld [vmem:[#allocation5 + $0x24] ss:$16 sps:$4 sm:$0xff]   ;;  %1267 = vmatpush1.bf16.msra.mxu1 %v3434_v2  ;;  %v3440_v6 = vld [vmem:[#allocation5 + $0x20] ss:$16 sps:$4 sm:$0xff]   ;;  %v4227_v48 = vpack.c.bf16 %v81_v46, %v81_v46  ;;  %v83_v49 = vld [vmem:[#allocation2 + $0x18] sm:$0xff]  ;;  %s2990_s30 = sshll.u32 %s4132_s29, 4  ;;  %s2991_s30 = int_to_ptr.vmem [resolvable:$true] %s2990_s30 }
  0x4d   :  { %1308 = vmatpush1.bf16.msra.mxu0 %v3435_v3  ;;  %v3438_v5 = vld [vmem:[#allocation5 + $0x224] ss:$16 sps:$4 sm:$0xff]   ;;  %1268 = vmatprep.subr.bf16.mxu1 %v3436_v4  ;;  %v3441_v7 = vld [vmem:[#allocation5 + $0x220] ss:$16 sps:$4 sm:$0xff]   ;;  %v4229_v52 = vpack.c.bf16 %v83_v49, %v83_v49  ;;  %v3583_v49 = vld [vmem:[#allocation5 + $0x128] ss:$16 sps:$4 sm:$0xff]   ;;  %p4099_p5 = scmp.lt.s32.totalorder %s2991_s30, %s2991_s30 }
  0x4e   :  { %1309 = vmatprep.subr.bf16.mxu0 %v3438_v5  ;;  %v3442_v8 = vld [vmem:[#allocation5 + $0x44] ss:$16 sps:$4 sm:$0xff]   ;;  %v3446_v10 = vld [vmem:[#allocation5 + $0x40] ss:$16 sps:$4 sm:$0xff]   ;;  %1298 = vmatprep.mubr.bf16.mxu1 %v4227_v48 }
  0x4f   :  { %v3444_v9 = vld [vmem:[#allocation5 + $0x244] ss:$16 sps:$4 sm:$0xff]   ;;  %v3447_v11 = vld [vmem:[#allocation5 + $0x240] ss:$16 sps:$4 sm:$0xff]   ;;  %1339 = vmatprep.mubr.bf16.mxu0 %v4229_v52 }
  0x50   :  { %1269 = vmatpush1.bf16.msra.mxu1 %v3440_v6  ;;  %v3448_v12 = vld [vmem:[#allocation5 + $0x64] ss:$16 sps:$4 sm:$0xff]   ;;  %v3452_v14 = vld [vmem:[#allocation5 + $0x60] ss:$16 sps:$4 sm:$0xff]  }
  0x51   :  { %1310 = vmatpush1.bf16.msra.mxu0 %v3441_v7  ;;  %1270 = vmatprep.subr.bf16.mxu1 %v3442_v8  ;;  %v3450_v13 = vld [vmem:[#allocation5 + $0x264] ss:$16 sps:$4 sm:$0xff]   ;;  %v3453_v15 = vld [vmem:[#allocation5 + $0x260] ss:$16 sps:$4 sm:$0xff]   ;;  %v3531_v7 = vld [vmem:[#allocation5 + $0xc] ss:$16 sps:$4 sm:$0xff]  }
  0x52   :  { %1311 = vmatprep.subr.bf16.mxu0 %v3444_v9  ;;  %v3454_v16 = vld [vmem:[#allocation5 + $0x84] ss:$16 sps:$4 sm:$0xff]   ;;  %v3458_v18 = vld [vmem:[#allocation5 + $0x80] ss:$16 sps:$4 sm:$0xff]  }
  0x53   :  { %v3456_v17 = vld [vmem:[#allocation5 + $0x284] ss:$16 sps:$4 sm:$0xff]   ;;  %v3459_v19 = vld [vmem:[#allocation5 + $0x280] ss:$16 sps:$4 sm:$0xff]  }
  0x54   :  { %1271 = vmatpush1.bf16.msra.mxu1 %v3446_v10  ;;  %v3460_v20 = vld [vmem:[#allocation5 + $0xa4] ss:$16 sps:$4 sm:$0xff]   ;;  %v3464_v22 = vld [vmem:[#allocation5 + $0xa0] ss:$16 sps:$4 sm:$0xff]   ;;  %v3529_v10 = vld [vmem:[#allocation5 + $0x8] ss:$16 sps:$4 sm:$0xff]  }
  0x55   :  { %1312 = vmatpush1.bf16.msra.mxu0 %v3447_v11  ;;  %1272 = vmatprep.subr.bf16.mxu1 %v3448_v12  ;;  %v3462_v21 = vld [vmem:[#allocation5 + $0x2a4] ss:$16 sps:$4 sm:$0xff]   ;;  %v3465_v23 = vld [vmem:[#allocation5 + $0x2a0] ss:$16 sps:$4 sm:$0xff]  }
  0x56   :  { %1313 = vmatprep.subr.bf16.mxu0 %v3450_v13  ;;  %v3466_v24 = vld [vmem:[#allocation5 + $0xc4] ss:$16 sps:$4 sm:$0xff]   ;;  %v3470_v26 = vld [vmem:[#allocation5 + $0xc0] ss:$16 sps:$4 sm:$0xff]   ;;  %v3537_v13 = vld [vmem:[#allocation5 + $0x2c] ss:$16 sps:$4 sm:$0xff]  }
  0x57   :  { %v3468_v25 = vld [vmem:[#allocation5 + $0x2c4] ss:$16 sps:$4 sm:$0xff]   ;;  %v3471_v27 = vld [vmem:[#allocation5 + $0x2c0] ss:$16 sps:$4 sm:$0xff]  }
  0x58   :  { %1273 = vmatpush1.bf16.msra.mxu1 %v3452_v14  ;;  %v3472_v28 = vld [vmem:[#allocation5 + $0xe4] ss:$16 sps:$4 sm:$0xff]   ;;  %v3476_v30 = vld [vmem:[#allocation5 + $0xe0] ss:$16 sps:$4 sm:$0xff]  }
  0x59   :  { %1314 = vmatpush1.bf16.msra.mxu0 %v3453_v15  ;;  %1274 = vmatprep.subr.bf16.mxu1 %v3454_v16  ;;  %v3474_v29 = vld [vmem:[#allocation5 + $0x2e4] ss:$16 sps:$4 sm:$0xff]   ;;  %v3477_v31 = vld [vmem:[#allocation5 + $0x2e0] ss:$16 sps:$4 sm:$0xff]   ;;  %v3535_v15 = vld [vmem:[#allocation5 + $0x28] ss:$16 sps:$4 sm:$0xff]  }
  0x5a   :  { %1315 = vmatprep.subr.bf16.mxu0 %v3456_v17  ;;  %v3478_v32 = vld [vmem:[#allocation5 + $0x104] ss:$16 sps:$4 sm:$0xff]   ;;  %v3482_v34 = vld [vmem:[#allocation5 + $0x100] ss:$16 sps:$4 sm:$0xff]   ;;  %v3543_v17 = vld [vmem:[#allocation5 + $0x4c] ss:$16 sps:$4 sm:$0xff]  }
  0x5b   :  { %v3480_v33 = vld [vmem:[#allocation5 + $0x304] ss:$16 sps:$4 sm:$0xff]   ;;  %v3483_v35 = vld [vmem:[#allocation5 + $0x300] ss:$16 sps:$4 sm:$0xff]  }
  0x5c   :  { %1275 = vmatpush1.bf16.msra.mxu1 %v3458_v18  ;;  %v3484_v36 = vld [vmem:[#allocation5 + $0x124] ss:$16 sps:$4 sm:$0xff]   ;;  %v3488_v38 = vld [vmem:[#allocation5 + $0x120] ss:$16 sps:$4 sm:$0xff]  }
  0x5d   :  { %1316 = vmatpush1.bf16.msra.mxu0 %v3459_v19  ;;  %1276 = vmatprep.subr.bf16.mxu1 %v3460_v20  ;;  %v3486_v37 = vld [vmem:[#allocation5 + $0x324] ss:$16 sps:$4 sm:$0xff]   ;;  %v3489_v39 = vld [vmem:[#allocation5 + $0x320] ss:$16 sps:$4 sm:$0xff]   ;;  %v3541_v19 = vld [vmem:[#allocation5 + $0x48] ss:$16 sps:$4 sm:$0xff]  }
  0x5e   :  { %1317 = vmatprep.subr.bf16.mxu0 %v3462_v21  ;;  %v3490_v40 = vld [vmem:[#allocation5 + $0x144] ss:$16 sps:$4 sm:$0xff]   ;;  %v3494_v42 = vld [vmem:[#allocation5 + $0x140] ss:$16 sps:$4 sm:$0xff]   ;;  %v3549_v21 = vld [vmem:[#allocation5 + $0x6c] ss:$16 sps:$4 sm:$0xff]  }
  0x5f   :  { %v3492_v41 = vld [vmem:[#allocation5 + $0x344] ss:$16 sps:$4 sm:$0xff]   ;;  %v3495_v43 = vld [vmem:[#allocation5 + $0x340] ss:$16 sps:$4 sm:$0xff]  }
  0x60   :  { %1277 = vmatpush1.bf16.msra.mxu1 %v3464_v22  ;;  %v3496_v44 = vld [vmem:[#allocation5 + $0x164] ss:$16 sps:$4 sm:$0xff]   ;;  %v3500_v47 = vld [vmem:[#allocation5 + $0x160] ss:$16 sps:$4 sm:$0xff]  }
  0x61   :  { %1318 = vmatpush1.bf16.msra.mxu0 %v3465_v23  ;;  %1278 = vmatprep.subr.bf16.mxu1 %v3466_v24  ;;  %v3498_v45 = vld [vmem:[#allocation5 + $0x364] ss:$16 sps:$4 sm:$0xff]   ;;  %v3501_v50 = vld [vmem:[#allocation5 + $0x360] ss:$16 sps:$4 sm:$0xff]   ;;  %v3547_v23 = vld [vmem:[#allocation5 + $0x68] ss:$16 sps:$4 sm:$0xff]  }
  0x62   :  { %1319 = vmatprep.subr.bf16.mxu0 %v3468_v25  ;;  %v3502_v51 = vld [vmem:[#allocation5 + $0x184] ss:$16 sps:$4 sm:$0xff]   ;;  %v3506_v54 = vld [vmem:[#allocation5 + $0x180] ss:$16 sps:$4 sm:$0xff]   ;;  %v3555_v25 = vld [vmem:[#allocation5 + $0x8c] ss:$16 sps:$4 sm:$0xff]  }
  0x63   :  { %v3504_v53 = vld [vmem:[#allocation5 + $0x384] ss:$16 sps:$4 sm:$0xff]   ;;  %v3507_v55 = vld [vmem:[#allocation5 + $0x380] ss:$16 sps:$4 sm:$0xff]  }
  0x64   :  { %1279 = vmatpush1.bf16.msra.mxu1 %v3470_v26  ;;  %v3508_v56 = vld [vmem:[#allocation5 + $0x1a4] ss:$16 sps:$4 sm:$0xff]   ;;  %v3512_v58 = vld [vmem:[#allocation5 + $0x1a0] ss:$16 sps:$4 sm:$0xff]  }
  0x65   :  { %1320 = vmatpush1.bf16.msra.mxu0 %v3471_v27  ;;  %1280 = vmatprep.subr.bf16.mxu1 %v3472_v28  ;;  %v3510_v57 = vld [vmem:[#allocation5 + $0x3a4] ss:$16 sps:$4 sm:$0xff]   ;;  %v3513_v59 = vld [vmem:[#allocation5 + $0x3a0] ss:$16 sps:$4 sm:$0xff]   ;;  %v3553_v27 = vld [vmem:[#allocation5 + $0x88] ss:$16 sps:$4 sm:$0xff]  }
  0x66   :  { %1321 = vmatprep.subr.bf16.mxu0 %v3474_v29  ;;  %v3514_v60 = vld [vmem:[#allocation5 + $0x1c4] ss:$16 sps:$4 sm:$0xff]   ;;  %v3518_v62 = vld [vmem:[#allocation5 + $0x1c0] ss:$16 sps:$4 sm:$0xff]   ;;  %v3561_v29 = vld [vmem:[#allocation5 + $0xac] ss:$16 sps:$4 sm:$0xff]  }
  0x67   :  { %v3516_v61 = vld [vmem:[#allocation5 + $0x3c4] ss:$16 sps:$4 sm:$0xff]   ;;  %v3519_v63 = vld [vmem:[#allocation5 + $0x3c0] ss:$16 sps:$4 sm:$0xff]  }
  0x68   :  { %1281 = vmatpush1.bf16.msra.mxu1 %v3476_v30  ;;  %v3520_v0 = vld [vmem:[#allocation5 + $0x1e4] ss:$16 sps:$4 sm:$0xff]   ;;  %v3524_v2 = vld [vmem:[#allocation5 + $0x1e0] ss:$16 sps:$4 sm:$0xff]  }
  0x69   :  { %1322 = vmatpush1.bf16.msra.mxu0 %v3477_v31  ;;  %1282 = vmatprep.subr.bf16.mxu1 %v3478_v32  ;;  %v3522_v1 = vld [vmem:[#allocation5 + $0x3e4] ss:$16 sps:$4 sm:$0xff]   ;;  %v3525_v3 = vld [vmem:[#allocation5 + $0x3e0] ss:$16 sps:$4 sm:$0xff]   ;;  %v3559_v31 = vld [vmem:[#allocation5 + $0xa8] ss:$16 sps:$4 sm:$0xff]  }
  0x6a   :  { %1323 = vmatprep.subr.bf16.mxu0 %v3480_v33  ;;  %v80_v4 = vld [vmem:[#allocation2] sm:$0xff]  ;;  %v82_v6 = vld [vmem:[#allocation2 + $0x10] sm:$0xff]  ;;  %v3567_v33 = vld [vmem:[#allocation5 + $0xcc] ss:$16 sps:$4 sm:$0xff]  }
  0x6b   :  { %v3528_v5 = vld [vmem:[#allocation5 + $0x404] ss:$16 sps:$4 sm:$0xff]   ;;  %v4233_v8 = vpack.c.bf16 %v80_v4, %v80_v4  ;;  %v3526_v9 = vld [vmem:[#allocation5 + $0x400] ss:$16 sps:$4 sm:$0xff]   ;;  %v4235_v11 = vpack.c.bf16 %v82_v6, %v82_v6  ;;  %v3615_v4 = vld [vmem:[#allocation5 + $0x1cc] ss:$16 sps:$4 sm:$0xff]  }
  0x6c   :  { %1283 = vmatpush1.bf16.msra.mxu1 %v3482_v34  ;;  %v3534_v12 = vld [vmem:[#allocation5 + $0x424] ss:$16 sps:$4 sm:$0xff]   ;;  %v3532_v14 = vld [vmem:[#allocation5 + $0x420] ss:$16 sps:$4 sm:$0xff]   ;;  %v85_v34 = vld [vmem:[#allocation2 + $0x28] sm:$0xff] }
  0x6d   :  { %1324 = vmatpush1.bf16.msra.mxu0 %v3483_v35  ;;  %1284 = vmatprep.subr.bf16.mxu1 %v3484_v36  ;;  %v3540_v16 = vld [vmem:[#allocation5 + $0x444] ss:$16 sps:$4 sm:$0xff]   ;;  %v3538_v18 = vld [vmem:[#allocation5 + $0x440] ss:$16 sps:$4 sm:$0xff]   ;;  %v4240_v35 = vpack.c.bf16 %v85_v34, %v85_v34  ;;  %v3613_v6 = vld [vmem:[#allocation5 + $0x1c8] ss:$16 sps:$4 sm:$0xff]  }
  0x6e   :  { %1325 = vmatprep.subr.bf16.mxu0 %v3486_v37  ;;  %v3546_v20 = vld [vmem:[#allocation5 + $0x464] ss:$16 sps:$4 sm:$0xff]   ;;  %v3544_v22 = vld [vmem:[#allocation5 + $0x460] ss:$16 sps:$4 sm:$0xff]   ;;  %v3565_v37 = vld [vmem:[#allocation5 + $0xc8] ss:$16 sps:$4 sm:$0xff]  }
  0x6f   :  { %v3552_v24 = vld [vmem:[#allocation5 + $0x484] ss:$16 sps:$4 sm:$0xff]   ;;  %v3550_v26 = vld [vmem:[#allocation5 + $0x480] ss:$16 sps:$4 sm:$0xff]  }
  0x70   :  { %1285 = vmatpush1.bf16.msra.mxu1 %v3488_v38  ;;  %v3558_v28 = vld [vmem:[#allocation5 + $0x4a4] ss:$16 sps:$4 sm:$0xff]   ;;  %v3556_v30 = vld [vmem:[#allocation5 + $0x4a0] ss:$16 sps:$4 sm:$0xff]  }
  0x71   :  { %1326 = vmatpush1.bf16.msra.mxu0 %v3489_v39  ;;  %1286 = vmatprep.subr.bf16.mxu1 %v3490_v40  ;;  %v3564_v32 = vld [vmem:[#allocation5 + $0x4c4] ss:$16 sps:$4 sm:$0xff]   ;;  %v3562_v36 = vld [vmem:[#allocation5 + $0x4c0] ss:$16 sps:$4 sm:$0xff]   ;;  %v3573_v39 = vld [vmem:[#allocation5 + $0xec] ss:$16 sps:$4 sm:$0xff]  }
  0x72   :  { %1327 = vmatprep.subr.bf16.mxu0 %v3492_v41  ;;  %v3570_v38 = vld [vmem:[#allocation5 + $0x4e4] ss:$16 sps:$4 sm:$0xff]   ;;  %v3568_v40 = vld [vmem:[#allocation5 + $0x4e0] ss:$16 sps:$4 sm:$0xff]   ;;  %v3571_v41 = vld [vmem:[#allocation5 + $0xe8] ss:$16 sps:$4 sm:$0xff]  }
  0x73   :  { %v3582_v46 = vld [vmem:[#allocation5 + $0x524] ss:$16 sps:$4 sm:$0xff]  }
  0x74   :  { %1287 = vmatpush1.bf16.msra.mxu1 %v3494_v42  ;;  %v3576_v42 = vld [vmem:[#allocation5 + $0x504] ss:$16 sps:$4 sm:$0xff]  }
  0x75   :  { %1328 = vmatpush1.bf16.msra.mxu0 %v3495_v43  ;;  %1288 = vmatprep.subr.bf16.mxu1 %v3496_v44  ;;  %v3579_v43 = vld [vmem:[#allocation5 + $0x10c] ss:$16 sps:$4 sm:$0xff]   ;;  %v3574_v44 = vld [vmem:[#allocation5 + $0x500] ss:$16 sps:$4 sm:$0xff]   ;;  %v3732_v34 = vld [vmem:[#allocation7 + $0x44] ss:$16 sps:$4 sm:$0xff]  }
  0x76   :  { %1329 = vmatprep.subr.bf16.mxu0 %v3498_v45  ;;  %v3577_v45 = vld [vmem:[#allocation5 + $0x108] ss:$16 sps:$4 sm:$0xff]  }
  0x78   :  { %1289 = vmatpush1.bf16.msra.mxu1 %v3500_v47  ;;  %v3585_v47 = vld [vmem:[#allocation5 + $0x12c] ss:$16 sps:$4 sm:$0xff]  }
  0x79   :  { %1330 = vmatpush1.bf16.msra.mxu0 %v3501_v50  ;;  %1290 = vmatprep.subr.bf16.mxu1 %v3502_v51  ;;  %v3588_v50 = vld [vmem:[#allocation5 + $0x544] ss:$16 sps:$4 sm:$0xff]   ;;  %v3591_v51 = vld [vmem:[#allocation5 + $0x14c] ss:$16 sps:$4 sm:$0xff]  }
  0x7a   :  { %1331 = vmatprep.subr.bf16.mxu0 %v3504_v53  ;;  %v3586_v53 = vld [vmem:[#allocation5 + $0x540] ss:$16 sps:$4 sm:$0xff]  }
  0x7c   :  { %1291 = vmatpush1.bf16.msra.mxu1 %v3506_v54  ;;  %v3589_v54 = vld [vmem:[#allocation5 + $0x148] ss:$16 sps:$4 sm:$0xff]  }
  0x7d   :  { %1332 = vmatpush1.bf16.msra.mxu0 %v3507_v55  ;;  %1292 = vmatprep.subr.bf16.mxu1 %v3508_v56  ;;  %v3594_v55 = vld [vmem:[#allocation5 + $0x564] ss:$16 sps:$4 sm:$0xff]   ;;  %v3597_v56 = vld [vmem:[#allocation5 + $0x16c] ss:$16 sps:$4 sm:$0xff]  }
  0x7e   :  { %1333 = vmatprep.subr.bf16.mxu0 %v3510_v57  ;;  %v3592_v57 = vld [vmem:[#allocation5 + $0x560] ss:$16 sps:$4 sm:$0xff]  }
  0x80   :  { %1293 = vmatpush1.bf16.msra.mxu1 %v3512_v58  ;;  %v3595_v58 = vld [vmem:[#allocation5 + $0x168] ss:$16 sps:$4 sm:$0xff]  }
  0x81   :  { %1334 = vmatpush1.bf16.msra.mxu0 %v3513_v59  ;;  %1294 = vmatprep.subr.bf16.mxu1 %v3514_v60  ;;  %v3600_v59 = vld [vmem:[#allocation5 + $0x584] ss:$16 sps:$4 sm:$0xff]   ;;  %v3603_v60 = vld [vmem:[#allocation5 + $0x18c] ss:$16 sps:$4 sm:$0xff]  }
  0x82   :  { %1335 = vmatprep.subr.bf16.mxu0 %v3516_v61  ;;  %v3598_v61 = vld [vmem:[#allocation5 + $0x580] ss:$16 sps:$4 sm:$0xff]  }
  0x84   :  { %1295 = vmatpush1.bf16.msra.mxu1 %v3518_v62  ;;  %v3601_v62 = vld [vmem:[#allocation5 + $0x188] ss:$16 sps:$4 sm:$0xff]  }
  0x85   :  { %1336 = vmatpush1.bf16.msra.mxu0 %v3519_v63  ;;  %1296 = vmatprep.subr.bf16.mxu1 %v3520_v0  ;;  %v3606_v63 = vld [vmem:[#allocation5 + $0x5a4] ss:$16 sps:$4 sm:$0xff]   ;;  %v3609_v0 = vld [vmem:[#allocation5 + $0x1ac] ss:$16 sps:$4 sm:$0xff]  }
  0x86   :  { %1337 = vmatprep.subr.bf16.mxu0 %v3522_v1  ;;  %v3604_v1 = vld [vmem:[#allocation5 + $0x5a0] ss:$16 sps:$4 sm:$0xff]  }
  0x88   :  { %1297 = vmatpush1.bf16.msra.mxu1 %v3524_v2  ;;  %v3607_v2 = vld [vmem:[#allocation5 + $0x1a8] ss:$16 sps:$4 sm:$0xff]  }
  0x89   :  { %1338 = vmatpush1.bf16.msra.mxu0 %v3525_v3  ;;  %1389 = vmatprep.subr.bf16.mxu1 %v3531_v7  ;;  %v3612_v3 = vld [vmem:[#allocation5 + $0x5c4] ss:$16 sps:$4 sm:$0xff]  }
  0x8a   :  { %1348 = vmatprep.subr.bf16.mxu0 %v3528_v5  ;;  %v3610_v5 = vld [vmem:[#allocation5 + $0x5c0] ss:$16 sps:$4 sm:$0xff]   ;;  %v3618_v7 = vld [vmem:[#allocation5 + $0x5e4] ss:$16 sps:$4 sm:$0xff]  }
  0x8b   :  { %1299 = vmatmul.mubr.bf16.vlgmr.msra.gmra.mrb[0].mxu1 %v4233_v8 }
  0x8c   :  { %1340 = vmatmul.mubr.bf16.vlgmr.msra.gmra.mrb[0].mxu0 %v4235_v11  ;;  %1390 = vmatpush1.bf16.msra.mxu1 %v3529_v10  ;;  %v3616_v10 = vld [vmem:[#allocation5 + $0x5e0] ss:$16 sps:$4 sm:$0xff]  }
  0x8d   :  { %1349 = vmatpush1.bf16.msra.mxu0 %v3526_v9  ;;  %1391 = vmatprep.subr.bf16.mxu1 %v3537_v13  ;;  %v3621_v9 = vld [vmem:[#allocation5 + $0x1ec] ss:$16 sps:$4 sm:$0xff]   ;;  %v84_v13 = vld [vmem:[#allocation2 + $0x20] sm:$0xff] }
  0x8e   :  { %1350 = vmatprep.subr.bf16.mxu0 %v3534_v12  ;;  %1421 = vmatprep.mubr.bf16.mxu1 %v4227_v48  ;;  %v3580_v48 = vld [vmem:[#allocation5 + $0x520] ss:$16 sps:$4 sm:$0xff]   ;;  %v3619_v12 = vld [vmem:[#allocation5 + $0x1e8] ss:$16 sps:$4 sm:$0xff]  }
  0x8f   :  { %1380 = vmatprep.mubr.bf16.mxu0 %v4240_v35 }
  0x90   :  { %1392 = vmatpush1.bf16.msra.mxu1 %v3535_v15  ;;  %v4243_v15 = vpack.c.bf16 %v84_v13, %v84_v13  ;;  %v3784_v13 = vld [vmem:[#allocation7 + $0x160] ss:$16 sps:$4 sm:$0xff]  }
  0x91   :  { %1351 = vmatpush1.bf16.msra.mxu0 %v3532_v14  ;;  %1393 = vmatprep.subr.bf16.mxu1 %v3543_v17  ;;  %v3624_v14 = vld [vmem:[#allocation5 + $0x20c] ss:$16 sps:$4 sm:$0xff]  }
  0x92   :  { %1352 = vmatprep.subr.bf16.mxu0 %v3540_v16  ;;  %v3622_v16 = vld [vmem:[#allocation5 + $0x208] ss:$16 sps:$4 sm:$0xff]   ;;  %v3627_v17 = vld [vmem:[#allocation5 + $0x22c] ss:$16 sps:$4 sm:$0xff]  }
  0x94   :  { %1394 = vmatpush1.bf16.msra.mxu1 %v3541_v19  ;;  %v3630_v19 = vld [vmem:[#allocation5 + $0x24c] ss:$16 sps:$4 sm:$0xff]  }
  0x95   :  { %1353 = vmatpush1.bf16.msra.mxu0 %v3538_v18  ;;  %1395 = vmatprep.subr.bf16.mxu1 %v3549_v21  ;;  %v3625_v18 = vld [vmem:[#allocation5 + $0x228] ss:$16 sps:$4 sm:$0xff]   ;;  %v3633_v21 = vld [vmem:[#allocation5 + $0x26c] ss:$16 sps:$4 sm:$0xff]  }
  0x96   :  { %1354 = vmatprep.subr.bf16.mxu0 %v3546_v20  ;;  %v3628_v20 = vld [vmem:[#allocation5 + $0x248] ss:$16 sps:$4 sm:$0xff]  }
  0x98   :  { %1396 = vmatpush1.bf16.msra.mxu1 %v3547_v23  ;;  %v3636_v23 = vld [vmem:[#allocation5 + $0x28c] ss:$16 sps:$4 sm:$0xff]  }
  0x99   :  { %1355 = vmatpush1.bf16.msra.mxu0 %v3544_v22  ;;  %1397 = vmatprep.subr.bf16.mxu1 %v3555_v25  ;;  %v3631_v22 = vld [vmem:[#allocation5 + $0x268] ss:$16 sps:$4 sm:$0xff]   ;;  %v3639_v25 = vld [vmem:[#allocation5 + $0x2ac] ss:$16 sps:$4 sm:$0xff]  }
  0x9a   :  { %1356 = vmatprep.subr.bf16.mxu0 %v3552_v24  ;;  %v3634_v24 = vld [vmem:[#allocation5 + $0x288] ss:$16 sps:$4 sm:$0xff]  }
  0x9c   :  { %1398 = vmatpush1.bf16.msra.mxu1 %v3553_v27  ;;  %v3642_v27 = vld [vmem:[#allocation5 + $0x2cc] ss:$16 sps:$4 sm:$0xff]  }
  0x9d   :  { %1357 = vmatpush1.bf16.msra.mxu0 %v3550_v26  ;;  %1399 = vmatprep.subr.bf16.mxu1 %v3561_v29  ;;  %v3637_v26 = vld [vmem:[#allocation5 + $0x2a8] ss:$16 sps:$4 sm:$0xff]   ;;  %v3720_v29 = vld [vmem:[#allocation7 + $0x4] ss:$16 sps:$4 sm:$0xff]  }
  0x9e   :  { %1358 = vmatprep.subr.bf16.mxu0 %v3558_v28  ;;  %v3718_v28 = vld [vmem:[#allocation7] ss:$16 sps:$4 sm:$0xff]  }
  0xa0   :  { %1400 = vmatpush1.bf16.msra.mxu1 %v3559_v31  ;;  %v3643_v31 = vld [vmem:[#allocation5 + $0x2e8] ss:$16 sps:$4 sm:$0xff]  }
  0xa1   :  { %1359 = vmatpush1.bf16.msra.mxu0 %v3556_v30  ;;  %1401 = vmatprep.subr.bf16.mxu1 %v3567_v33  ;;  %v3726_v30 = vld [vmem:[#allocation7 + $0x24] ss:$16 sps:$4 sm:$0xff]   ;;  %v3648_v33 = vld [vmem:[#allocation5 + $0x30c] ss:$16 sps:$4 sm:$0xff]  }
  0xa2   :  { %1360 = vmatprep.subr.bf16.mxu0 %v3564_v32  ;;  %v3724_v32 = vld [vmem:[#allocation7 + $0x20] ss:$16 sps:$4 sm:$0xff]  }
  0xa4   :  { %1402 = vmatpush1.bf16.msra.mxu1 %v3565_v37  ;;  %v3730_v37 = vld [vmem:[#allocation7 + $0x40] ss:$16 sps:$4 sm:$0xff]  }
  0xa5   :  { %1361 = vmatpush1.bf16.msra.mxu0 %v3562_v36  ;;  %1403 = vmatprep.subr.bf16.mxu1 %v3573_v39  ;;  %v3646_v36 = vld [vmem:[#allocation5 + $0x308] ss:$16 sps:$4 sm:$0xff]   ;;  %v3738_v39 = vld [vmem:[#allocation7 + $0x64] ss:$16 sps:$4 sm:$0xff]  }
  0xa6   :  { %1362 = vmatprep.subr.bf16.mxu0 %v3570_v38  ;;  %v3651_v38 = vld [vmem:[#allocation5 + $0x32c] ss:$16 sps:$4 sm:$0xff]  }
  0xa8   :  { %1404 = vmatpush1.bf16.msra.mxu1 %v3571_v41  ;;  %v3736_v41 = vld [vmem:[#allocation7 + $0x60] ss:$16 sps:$4 sm:$0xff]  }
  0xa9   :  { %1363 = vmatpush1.bf16.msra.mxu0 %v3568_v40  ;;  %1405 = vmatprep.subr.bf16.mxu1 %v3579_v43  ;;  %v3649_v40 = vld [vmem:[#allocation5 + $0x328] ss:$16 sps:$4 sm:$0xff]   ;;  %v3744_v43 = vld [vmem:[#allocation7 + $0x84] ss:$16 sps:$4 sm:$0xff]  }
  0xaa   :  { %1364 = vmatprep.subr.bf16.mxu0 %v3576_v42  ;;  %v3654_v42 = vld [vmem:[#allocation5 + $0x34c] ss:$16 sps:$4 sm:$0xff]  }
  0xac   :  { %1406 = vmatpush1.bf16.msra.mxu1 %v3577_v45  ;;  %v3657_v45 = vld [vmem:[#allocation5 + $0x36c] ss:$16 sps:$4 sm:$0xff]  }
  0xad   :  { %1365 = vmatpush1.bf16.msra.mxu0 %v3574_v44  ;;  %1407 = vmatprep.subr.bf16.mxu1 %v3585_v47  ;;  %v3652_v44 = vld [vmem:[#allocation5 + $0x348] ss:$16 sps:$4 sm:$0xff]   ;;  %v3750_v47 = vld [vmem:[#allocation7 + $0xa4] ss:$16 sps:$4 sm:$0xff]  }
  0xae   :  { %1366 = vmatprep.subr.bf16.mxu0 %v3582_v46  ;;  %v3742_v46 = vld [vmem:[#allocation7 + $0x80] ss:$16 sps:$4 sm:$0xff]  }
  0xb0   :  { %1408 = vmatpush1.bf16.msra.mxu1 %v3583_v49  ;;  %v3660_v49 = vld [vmem:[#allocation5 + $0x38c] ss:$16 sps:$4 sm:$0xff]  }
  0xb1   :  { %1367 = vmatpush1.bf16.msra.mxu0 %v3580_v48  ;;  %1409 = vmatprep.subr.bf16.mxu1 %v3591_v51  ;;  %v3655_v48 = vld [vmem:[#allocation5 + $0x368] ss:$16 sps:$4 sm:$0xff]   ;;  %v3756_v51 = vld [vmem:[#allocation7 + $0xc4] ss:$16 sps:$4 sm:$0xff]  }
  0xb2   :  { %1368 = vmatprep.subr.bf16.mxu0 %v3588_v50  ;;  %v3748_v50 = vld [vmem:[#allocation7 + $0xa0] ss:$16 sps:$4 sm:$0xff]  }
  0xb4   :  { %1410 = vmatpush1.bf16.msra.mxu1 %v3589_v54  ;;  %v3663_v54 = vld [vmem:[#allocation5 + $0x3ac] ss:$16 sps:$4 sm:$0xff]  }
  0xb5   :  { %1369 = vmatpush1.bf16.msra.mxu0 %v3586_v53  ;;  %1411 = vmatprep.subr.bf16.mxu1 %v3597_v56  ;;  %v3658_v53 = vld [vmem:[#allocation5 + $0x388] ss:$16 sps:$4 sm:$0xff]   ;;  %v3762_v56 = vld [vmem:[#allocation7 + $0xe4] ss:$16 sps:$4 sm:$0xff]  }
  0xb6   :  { %1370 = vmatprep.subr.bf16.mxu0 %v3594_v55  ;;  %v3754_v55 = vld [vmem:[#allocation7 + $0xc0] ss:$16 sps:$4 sm:$0xff]  }
  0xb8   :  { %1412 = vmatpush1.bf16.msra.mxu1 %v3595_v58  ;;  %v3666_v58 = vld [vmem:[#allocation5 + $0x3cc] ss:$16 sps:$4 sm:$0xff]  }
  0xb9   :  { %1371 = vmatpush1.bf16.msra.mxu0 %v3592_v57  ;;  %1413 = vmatprep.subr.bf16.mxu1 %v3603_v60  ;;  %v3661_v57 = vld [vmem:[#allocation5 + $0x3a8] ss:$16 sps:$4 sm:$0xff]   ;;  %v3768_v60 = vld [vmem:[#allocation7 + $0x104] ss:$16 sps:$4 sm:$0xff]  }
  0xba   :  { %1372 = vmatprep.subr.bf16.mxu0 %v3600_v59  ;;  %v3760_v59 = vld [vmem:[#allocation7 + $0xe0] ss:$16 sps:$4 sm:$0xff]  }
  0xbc   :  { %1414 = vmatpush1.bf16.msra.mxu1 %v3601_v62  ;;  %v3766_v62 = vld [vmem:[#allocation7 + $0x100] ss:$16 sps:$4 sm:$0xff]  }
  0xbd   :  { %1373 = vmatpush1.bf16.msra.mxu0 %v3598_v61  ;;  %1415 = vmatprep.subr.bf16.mxu1 %v3609_v0  ;;  %v3664_v61 = vld [vmem:[#allocation5 + $0x3c8] ss:$16 sps:$4 sm:$0xff]   ;;  %v3774_v0 = vld [vmem:[#allocation7 + $0x124] ss:$16 sps:$4 sm:$0xff]  }
  0xbe   :  { %1374 = vmatprep.subr.bf16.mxu0 %v3606_v63  ;;  %v3669_v63 = vld [vmem:[#allocation5 + $0x3ec] ss:$16 sps:$4 sm:$0xff]  }
  0xc0   :  { %1416 = vmatpush1.bf16.msra.mxu1 %v3607_v2  ;;  %v3772_v2 = vld [vmem:[#allocation7 + $0x120] ss:$16 sps:$4 sm:$0xff]  }
  0xc1   :  { %1375 = vmatpush1.bf16.msra.mxu0 %v3604_v1  ;;  %1417 = vmatprep.subr.bf16.mxu1 %v3615_v4  ;;  %v3667_v1 = vld [vmem:[#allocation5 + $0x3e8] ss:$16 sps:$4 sm:$0xff]   ;;  %v3780_v4 = vld [vmem:[#allocation7 + $0x144] ss:$16 sps:$4 sm:$0xff]  }
  0xc2   :  { %1376 = vmatprep.subr.bf16.mxu0 %v3612_v3  ;;  %v3672_v3 = vld [vmem:[#allocation5 + $0x40c] ss:$16 sps:$4 sm:$0xff]  }
  0xc4   :  { %1418 = vmatpush1.bf16.msra.mxu1 %v3613_v6  ;;  %v3675_v6 = vld [vmem:[#allocation5 + $0x42c] ss:$16 sps:$4 sm:$0xff]  }
  0xc5   :  { %1377 = vmatpush1.bf16.msra.mxu0 %v3610_v5  ;;  %1419 = vmatprep.subr.bf16.mxu1 %v3621_v9  ;;  %v3670_v5 = vld [vmem:[#allocation5 + $0x408] ss:$16 sps:$4 sm:$0xff]   ;;  %v3786_v9 = vld [vmem:[#allocation7 + $0x164] ss:$16 sps:$4 sm:$0xff]  }
  0xc6   :  { %1378 = vmatprep.subr.bf16.mxu0 %v3618_v7  ;;  %v3778_v7 = vld [vmem:[#allocation7 + $0x140] ss:$16 sps:$4 sm:$0xff]  }
  0xc8   :  { %1420 = vmatpush1.bf16.msra.mxu1 %v3619_v12  ;;  %v3678_v12 = vld [vmem:[#allocation5 + $0x44c] ss:$16 sps:$4 sm:$0xff]  }
  0xc9   :  { %1379 = vmatpush1.bf16.msra.mxu0 %v3616_v10  ;;  %1430 = vmatprep.subr.bf16.mxu1 %v3624_v14  ;;  %v3673_v10 = vld [vmem:[#allocation5 + $0x428] ss:$16 sps:$4 sm:$0xff]   ;;  %v3792_v14 = vld [vmem:[#allocation7 + $0x184] ss:$16 sps:$4 sm:$0xff]  }
  0xca   :  { %2318 = vmatprep.subr.bf16.mxu0 %v3720_v29  ;;  %v3691_v29 = vld [vmem:[#allocation5 + $0x4e8] ss:$16 sps:$4 sm:$0xff]  }
  0xcb   :  { %1422 = vmatmul.mubr.bf16.vlgmr.msra.gmra.mrb[4].mxu1 %v4233_v8  ;;  %v3640_v8 = vld [vmem:[#allocation5 + $0x2c8] ss:$16 sps:$4 sm:$0xff]  }
  0xcc   :  { %1381 = vmatmul.mubr.bf16.vlgmr.msra.gmra.mrb[0].mxu0 %v4243_v15  ;;  %1431 = vmatpush1.bf16.msra.mxu1 %v3622_v16  ;;  %v3676_v16 = vld [vmem:[#allocation5 + $0x448] ss:$16 sps:$4 sm:$0xff]  }
  0xcd   :  { %1462 = vmatprep.mubr.bf16.mxu1 %v4229_v52  ;;  %1432 = vmatprep.subr.bf16.mxu1 %v3627_v17  ;;  %v3645_v52 = vld [vmem:[#allocation5 + $0x2ec] ss:$16 sps:$4 sm:$0xff]  }
  0xce   :  { %2319 = vmatpush1.bf16.msra.mxu0 %v3718_v28  ;;  %v3681_v17 = vld [vmem:[#allocation5 + $0x46c] ss:$16 sps:$4 sm:$0xff]   ;;  %v3808_v28 = vld [vmem:[#allocation7 + $0x1e0] ss:$16 sps:$4 sm:$0xff]  }
  0xcf   :  { %2320 = vmatprep.subr.bf16.mxu0 %v3726_v30  ;;  %v3696_v30 = vld [vmem:[#allocation5 + $0x50c] ss:$16 sps:$4 sm:$0xff]  }
  0xd0   :  { %1433 = vmatpush1.bf16.msra.mxu1 %v3625_v18  ;;  %v3790_v18 = vld [vmem:[#allocation7 + $0x180] ss:$16 sps:$4 sm:$0xff]  }
  0xd1   :  { %1434 = vmatprep.subr.bf16.mxu1 %v3630_v19  ;;  %v3798_v19 = vld [vmem:[#allocation7 + $0x1a4] ss:$16 sps:$4 sm:$0xff]  }
  0xd2   :  { %2321 = vmatpush1.bf16.msra.mxu0 %v3724_v32  ;;  %v3816_v32 = vld [vmem:[#allocation7 + $0x204] ss:$16 sps:$4 sm:$0xff]  }
  0xd3   :  { %2322 = vmatprep.subr.bf16.mxu0 %v3732_v34  ;;  %v3697_v34 = vld [vmem:[#allocation5 + $0x528] ss:$16 sps:$4 sm:$0xff]  }
  0xd4   :  { %1435 = vmatpush1.bf16.msra.mxu1 %v3628_v20  ;;  %v3679_v20 = vld [vmem:[#allocation5 + $0x468] ss:$16 sps:$4 sm:$0xff]  }
  0xd5   :  { %1436 = vmatprep.subr.bf16.mxu1 %v3633_v21  ;;  %v3684_v21 = vld [vmem:[#allocation5 + $0x48c] ss:$16 sps:$4 sm:$0xff]  }
  0xd6   :  { %2323 = vmatpush1.bf16.msra.mxu0 %v3730_v37  ;;  %v3700_v37 = vld [vmem:[#allocation5 + $0x548] ss:$16 sps:$4 sm:$0xff]  }
  0xd7   :  { %2324 = vmatprep.subr.bf16.mxu0 %v3738_v39  ;;  %v3703_v39 = vld [vmem:[#allocation5 + $0x568] ss:$16 sps:$4 sm:$0xff]  }
  0xd8   :  { %1437 = vmatpush1.bf16.msra.mxu1 %v3631_v22  ;;  %v3682_v22 = vld [vmem:[#allocation5 + $0x488] ss:$16 sps:$4 sm:$0xff]  }
  0xd9   :  { %1438 = vmatprep.subr.bf16.mxu1 %v3636_v23  ;;  %v3685_v23 = vld [vmem:[#allocation5 + $0x4a8] ss:$16 sps:$4 sm:$0xff]  }
  0xda   :  { %2325 = vmatpush1.bf16.msra.mxu0 %v3736_v41  ;;  %v3706_v41 = vld [vmem:[#allocation5 + $0x588] ss:$16 sps:$4 sm:$0xff]  }
  0xdb   :  { %2326 = vmatprep.subr.bf16.mxu0 %v3744_v43  ;;  %v3709_v43 = vld [vmem:[#allocation5 + $0x5a8] ss:$16 sps:$4 sm:$0xff]  }
  0xdc   :  { %1439 = vmatpush1.bf16.msra.mxu1 %v3634_v24  ;;  %v3690_v24 = vld [vmem:[#allocation5 + $0x4cc] ss:$16 sps:$4 sm:$0xff]  }
  0xdd   :  { %1440 = vmatprep.subr.bf16.mxu1 %v3639_v25  ;;  %v3804_v25 = vld [vmem:[#allocation7 + $0x1c4] ss:$16 sps:$4 sm:$0xff]  }
  0xde   :  { %2327 = vmatpush1.bf16.msra.mxu0 %v3742_v46  ;;  %v3717_v46 = vld [vmem:[#allocation5 + $0x5ec] ss:$16 sps:$4 sm:$0xff]  }
  0xdf   :  { %2328 = vmatprep.subr.bf16.mxu0 %v3750_v47  ;;  %v3715_v47 = vld [vmem:[#allocation5 + $0x5e8] ss:$16 sps:$4 sm:$0xff]  }
  0xe0   :  { %1441 = vmatpush1.bf16.msra.mxu1 %v3637_v26  ;;  %v3802_v26 = vld [vmem:[#allocation7 + $0x1c0] ss:$16 sps:$4 sm:$0xff]  }
  0xe1   :  { %1442 = vmatprep.subr.bf16.mxu1 %v3642_v27  ;;  %v3688_v27 = vld [vmem:[#allocation5 + $0x4c8] ss:$16 sps:$4 sm:$0xff]  }
  0xe2   :  { %2329 = vmatpush1.bf16.msra.mxu0 %v3748_v50  ;;  %v3729_v50 = vld [vmem:[#allocation7 + $0x2c] ss:$16 sps:$4 sm:$0xff]  }
  0xe3   :  { %2330 = vmatprep.subr.bf16.mxu0 %v3756_v51  ;;  %v3727_v51 = vld [vmem:[#allocation7 + $0x28] ss:$16 sps:$4 sm:$0xff]  }
  0xe4   :  { %1443 = vmatpush1.bf16.msra.mxu1 %v3640_v8  ;;  %v3693_v8 = vld [vmem:[#allocation5 + $0x4ec] ss:$16 sps:$4 sm:$0xff]  }
  0xe5   :  { %1444 = vmatprep.subr.bf16.mxu1 %v3645_v52  ;;  %v3810_v52 = vld [vmem:[#allocation7 + $0x1e4] ss:$16 sps:$4 sm:$0xff]  }
  0xe6   :  { %2331 = vmatpush1.bf16.msra.mxu0 %v3754_v55  ;;  %v3741_v55 = vld [vmem:[#allocation7 + $0x6c] ss:$16 sps:$4 sm:$0xff]  }
  0xe7   :  { %2332 = vmatprep.subr.bf16.mxu0 %v3762_v56  ;;  %v3739_v56 = vld [vmem:[#allocation7 + $0x68] ss:$16 sps:$4 sm:$0xff]  }
  0xe8   :  { %1445 = vmatpush1.bf16.msra.mxu1 %v3643_v31  ;;  %v3694_v31 = vld [vmem:[#allocation5 + $0x508] ss:$16 sps:$4 sm:$0xff]  }
  0xe9   :  { %1446 = vmatprep.subr.bf16.mxu1 %v3648_v33  ;;  %v3699_v33 = vld [vmem:[#allocation5 + $0x52c] ss:$16 sps:$4 sm:$0xff]  }
  0xea   :  { %2333 = vmatpush1.bf16.msra.mxu0 %v3760_v59  ;;  %v3753_v59 = vld [vmem:[#allocation7 + $0xac] ss:$16 sps:$4 sm:$0xff]  }
  0xeb   :  { %2334 = vmatprep.subr.bf16.mxu0 %v3768_v60  ;;  %v3751_v60 = vld [vmem:[#allocation7 + $0xa8] ss:$16 sps:$4 sm:$0xff]  }
  0xec   :  { %1447 = vmatpush1.bf16.msra.mxu1 %v3646_v36  ;;  %v3702_v36 = vld [vmem:[#allocation5 + $0x54c] ss:$16 sps:$4 sm:$0xff]  }
  0xed   :  { %1448 = vmatprep.subr.bf16.mxu1 %v3651_v38  ;;  %v3705_v38 = vld [vmem:[#allocation5 + $0x56c] ss:$16 sps:$4 sm:$0xff]  }
  0xee   :  { %2335 = vmatpush1.bf16.msra.mxu0 %v3766_v62 }
  0xef   :  { %2336 = vmatprep.subr.bf16.mxu0 %v3774_v0  ;;  %v3757_v0 = vld [vmem:[#allocation7 + $0xc8] ss:$16 sps:$4 sm:$0xff]  }
  0xf0   :  { %1449 = vmatpush1.bf16.msra.mxu1 %v3649_v40  ;;  %v3708_v40 = vld [vmem:[#allocation5 + $0x58c] ss:$16 sps:$4 sm:$0xff]  }
  0xf1   :  { %1450 = vmatprep.subr.bf16.mxu1 %v3654_v42  ;;  %v3711_v42 = vld [vmem:[#allocation5 + $0x5ac] ss:$16 sps:$4 sm:$0xff]  }
  0xf2   :  { %2337 = vmatpush1.bf16.msra.mxu0 %v3772_v2  ;;  %v3765_v2 = vld [vmem:[#allocation7 + $0xec] ss:$16 sps:$4 sm:$0xff]  }
  0xf3   :  { %2338 = vmatprep.subr.bf16.mxu0 %v3780_v4  ;;  %v3771_v4 = vld [vmem:[#allocation7 + $0x10c] ss:$16 sps:$4 sm:$0xff]  }
  0xf4   :  { %1451 = vmatpush1.bf16.msra.mxu1 %v3652_v44  ;;  %v3714_v44 = vld [vmem:[#allocation5 + $0x5cc] ss:$16 sps:$4 sm:$0xff]  }
  0xf5   :  { %1452 = vmatprep.subr.bf16.mxu1 %v3657_v45  ;;  %v3712_v45 = vld [vmem:[#allocation5 + $0x5c8] ss:$16 sps:$4 sm:$0xff]  }
  0xf6   :  { %2339 = vmatpush1.bf16.msra.mxu0 %v3778_v7  ;;  %v3775_v7 = vld [vmem:[#allocation7 + $0x128] ss:$16 sps:$4 sm:$0xff]  }
  0xf7   :  { %2340 = vmatprep.subr.bf16.mxu0 %v3786_v9  ;;  %v3783_v9 = vld [vmem:[#allocation7 + $0x14c] ss:$16 sps:$4 sm:$0xff]  }
  0xf8   :  { %1453 = vmatpush1.bf16.msra.mxu1 %v3655_v48  ;;  %v3723_v48 = vld [vmem:[#allocation7 + $0xc] ss:$16 sps:$4 sm:$0xff]  }
  0xf9   :  { %1454 = vmatprep.subr.bf16.mxu1 %v3660_v49  ;;  %v3721_v49 = vld [vmem:[#allocation7 + $0x8] ss:$16 sps:$4 sm:$0xff]  }
  0xfa   :  { %2341 = vmatpush1.bf16.msra.mxu0 %v3784_v13  ;;  %v3787_v13 = vld [vmem:[#allocation7 + $0x168] ss:$16 sps:$4 sm:$0xff]  }
  0xfb   :  { %2342 = vmatprep.subr.bf16.mxu0 %v3792_v14  ;;  %v3795_v14 = vld [vmem:[#allocation7 + $0x18c] ss:$16 sps:$4 sm:$0xff]  }
  0xfc   :  { %1455 = vmatpush1.bf16.msra.mxu1 %v3658_v53  ;;  %v3735_v53 = vld [vmem:[#allocation7 + $0x4c] ss:$16 sps:$4 sm:$0xff]  }
  0xfd   :  { %1456 = vmatprep.subr.bf16.mxu1 %v3663_v54  ;;  %v3733_v54 = vld [vmem:[#allocation7 + $0x48] ss:$16 sps:$4 sm:$0xff]  }
  0xfe   :  { %2343 = vmatpush1.bf16.msra.mxu0 %v3790_v18  ;;  %v3799_v18 = vld [vmem:[#allocation7 + $0x1a8] ss:$16 sps:$4 sm:$0xff]  }
  0xff   :  { %2344 = vmatprep.subr.bf16.mxu0 %v3798_v19  ;;  %v3807_v19 = vld [vmem:[#allocation7 + $0x1cc] ss:$16 sps:$4 sm:$0xff]  }
 0x100   :  { %1457 = vmatpush1.bf16.msra.mxu1 %v3661_v57  ;;  %v3747_v57 = vld [vmem:[#allocation7 + $0x8c] ss:$16 sps:$4 sm:$0xff]  }
 0x101   :  { %1458 = vmatprep.subr.bf16.mxu1 %v3666_v58  ;;  %v3745_v58 = vld [vmem:[#allocation7 + $0x88] ss:$16 sps:$4 sm:$0xff]  }
 0x104   :  { %1459 = vmatpush1.bf16.msra.mxu1 %v3664_v61 }
 0x105   :  { %1460 = vmatprep.subr.bf16.mxu1 %v3669_v63 }
 0x108   :  { %1461 = vmatpush1.bf16.msra.mxu1 %v3667_v1 }
 0x109   :  { %1471 = vmatprep.subr.bf16.mxu1 %v3672_v3  ;;  %v3763_v3 = vld [vmem:[#allocation7 + $0xe8] ss:$16 sps:$4 sm:$0xff]  }
 0x10b   :  { %1463 = vmatmul.mubr.bf16.vlgmr.msra.gmra.mrb[4].mxu1 %v4235_v11  ;;  %v3796_v11 = vld [vmem:[#allocation7 + $0x1a0] ss:$16 sps:$4 sm:$0xff]  }
 0x10c   :  { %1472 = vmatpush1.bf16.msra.mxu1 %v3670_v5  ;;  %1503 = vmatprep.mubr.bf16.mxu1 %v4240_v35  ;;  %v3687_v35 = vld [vmem:[#allocation5 + $0x4ac] ss:$16 sps:$4 sm:$0xff]   ;;  %v3769_v5 = vld [vmem:[#allocation7 + $0x108] ss:$16 sps:$4 sm:$0xff]  }
 0x10d   :  { %1473 = vmatprep.subr.bf16.mxu1 %v3675_v6  ;;  %2345 = vmatpush1.bf16.msra.mxu0 %v3796_v11  ;;  %v3777_v6 = vld [vmem:[#allocation7 + $0x12c] ss:$16 sps:$4 sm:$0xff]   ;;  %v3811_v11 = vld [vmem:[#allocation7 + $0x1e8] ss:$16 sps:$4 sm:$0xff]  }
 0x10e   :  { %2346 = vmatprep.subr.bf16.mxu0 %v3804_v25  ;;  %v4259_v25 = vld [vmem:[%s4313_s2] sm:$0xf] }
 0x110   :  { %1474 = vmatpush1.bf16.msra.mxu1 %v3673_v10  ;;  %v3781_v10 = vld [vmem:[#allocation7 + $0x148] ss:$16 sps:$4 sm:$0xff]  }
 0x111   :  { %1475 = vmatprep.subr.bf16.mxu1 %v3678_v12  ;;  %2347 = vmatpush1.bf16.msra.mxu0 %v3802_v26  ;;  %v3789_v12 = vld [vmem:[#allocation7 + $0x16c] ss:$16 sps:$4 sm:$0xff]  }
 0x112   :  { %2348 = vmatprep.subr.bf16.mxu0 %v3810_v52 }
 0x114   :  { %1476 = vmatpush1.bf16.msra.mxu1 %v3676_v16  ;;  %v3793_v16 = vld [vmem:[#allocation7 + $0x188] ss:$16 sps:$4 sm:$0xff]  }
 0x115   :  { %1477 = vmatprep.subr.bf16.mxu1 %v3681_v17  ;;  %2349 = vmatpush1.bf16.msra.mxu0 %v3808_v28  ;;  %v3801_v17 = vld [vmem:[#allocation7 + $0x1ac] ss:$16 sps:$4 sm:$0xff]  }
 0x116   :  { %2359 = vmatprep.subr.bf16.mxu0 %v3816_v32 }
 0x118   :  { %1478 = vmatpush1.bf16.msra.mxu1 %v3679_v20  ;;  %v3805_v20 = vld [vmem:[#allocation7 + $0x1c8] ss:$16 sps:$4 sm:$0xff]  }
 0x119   :  { %1479 = vmatprep.subr.bf16.mxu1 %v3684_v21  ;;  %v3813_v21 = vld [vmem:[#allocation7 + $0x1ec] ss:$16 sps:$4 sm:$0xff]  }
 0x11c   :  { %1480 = vmatpush1.bf16.msra.mxu1 %v3682_v22  ;;  %v3819_v22 = vld [vmem:[#allocation7 + $0x20c] ss:$16 sps:$4 sm:$0xff]  }
 0x11d   :  { %1481 = vmatprep.subr.bf16.mxu1 %v3687_v35  ;;  %v286_v35 = vlaneseq }
 0x120   :  { %1482 = vmatpush1.bf16.msra.mxu1 %v3685_v23  ;;  %v4251_v23 = vshrl.u32 %v286_v35, 7  ;;  %v3885_v35 = vld [vmem:[#allocation7 + $0x36c] ss:$16 sps:$4 sm:$0xff]  }
 0x121   :  { %1483 = vmatprep.subr.bf16.mxu1 %v3690_v24 }
 0x122   :  { %v4254_v24 = vsub.s32 0, %v4251_v23  ;;  %v4262_v26 = vsub.s32 1, %v4251_v23 }
 0x124   :  { %1484 = vmatpush1.bf16.msra.mxu1 %v3688_v27  ;;  %v289_v27 = vrot.slane %v4259_v25, %v4254_v24 }
 0x125   :  { %1485 = vmatprep.subr.bf16.mxu1 %v3693_v8  ;;  %v293_v8 = vrot.slane %v4259_v25, %v4262_v26 }
 0x128   :  { %1486 = vmatpush1.bf16.msra.mxu1 %v3691_v29 }
 0x129   :  { %1487 = vmatprep.subr.bf16.mxu1 %v3696_v30 }
 0x12c   :  { %1488 = vmatpush1.bf16.msra.mxu1 %v3694_v31 }
 0x12d   :  { %1489 = vmatprep.subr.bf16.mxu1 %v3699_v33 }
 0x130   :  { %1490 = vmatpush1.bf16.msra.mxu1 %v3697_v34 }
 0x131   :  { %1491 = vmatprep.subr.bf16.mxu1 %v3702_v36 }
 0x134   :  { %1492 = vmatpush1.bf16.msra.mxu1 %v3700_v37 }
 0x135   :  { %1493 = vmatprep.subr.bf16.mxu1 %v3705_v38 }
 0x138   :  { %1494 = vmatpush1.bf16.msra.mxu1 %v3703_v39 }
 0x139   :  { %1495 = vmatprep.subr.bf16.mxu1 %v3708_v40 }
 0x13c   :  { %1496 = vmatpush1.bf16.msra.mxu1 %v3706_v41  ;;  %v3814_v41 = vld [vmem:[#allocation7 + $0x200] ss:$16 sps:$4 sm:$0xff]  }
 0x13d   :  { %1497 = vmatprep.subr.bf16.mxu1 %v3711_v42  ;;  %v3817_v42 = vld [vmem:[#allocation7 + $0x208] ss:$16 sps:$4 sm:$0xff]  }
 0x140   :  { %1498 = vmatpush1.bf16.msra.mxu1 %v3709_v43 }
 0x141   :  { %1499 = vmatprep.subr.bf16.mxu1 %v3714_v44  ;;  %v3822_v44 = vld [vmem:[#allocation7 + $0x224] ss:$16 sps:$4 sm:$0xff]  }
 0x144   :  { %1500 = vmatpush1.bf16.msra.mxu1 %v3712_v45  ;;  %v3825_v45 = vld [vmem:[#allocation7 + $0x22c] ss:$16 sps:$4 sm:$0xff]  }
 0x145   :  { %1501 = vmatprep.subr.bf16.mxu1 %v3717_v46  ;;  %v3820_v46 = vld [vmem:[#allocation7 + $0x220] ss:$16 sps:$4 sm:$0xff]  }
 0x148   :  { %1502 = vmatpush1.bf16.msra.mxu1 %v3715_v47  ;;  %v3823_v47 = vld [vmem:[#allocation7 + $0x228] ss:$16 sps:$4 sm:$0xff]  }
 0x149   :  { %2400 = vmatprep.subr.bf16.mxu1 %v3723_v48  ;;  %v3828_v48 = vld [vmem:[#allocation7 + $0x244] ss:$16 sps:$4 sm:$0xff]  }
 0x14b   :  { %1504 = vmatmul.mubr.bf16.vlgmr.msra.gmra.mrb[4].mxu1 %v4243_v15  ;;  %v3759_v15 = vld [vmem:[#allocation7 + $0xcc] ss:$16 sps:$4 sm:$0xff]  }
 0x14c   :  { %2401 = vmatpush1.bf16.msra.mxu1 %v3721_v49  ;;  %v3831_v49 = vld [vmem:[#allocation7 + $0x24c] ss:$16 sps:$4 sm:$0xff]  }
 0x14d   :  { %2402 = vmatprep.subr.bf16.mxu1 %v3729_v50  ;;  %v3826_v50 = vld [vmem:[#allocation7 + $0x240] ss:$16 sps:$4 sm:$0xff]  }
 0x150   :  { %2403 = vmatpush1.bf16.msra.mxu1 %v3727_v51  ;;  %v3829_v51 = vld [vmem:[#allocation7 + $0x248] ss:$16 sps:$4 sm:$0xff]  }
 0x151   :  { %2404 = vmatprep.subr.bf16.mxu1 %v3735_v53  ;;  %v3834_v53 = vld [vmem:[#allocation7 + $0x264] ss:$16 sps:$4 sm:$0xff]  }
 0x154   :  { %2405 = vmatpush1.bf16.msra.mxu1 %v3733_v54  ;;  %v3837_v54 = vld [vmem:[#allocation7 + $0x26c] ss:$16 sps:$4 sm:$0xff]  }
 0x155   :  { %2406 = vmatprep.subr.bf16.mxu1 %v3741_v55  ;;  %v3832_v55 = vld [vmem:[#allocation7 + $0x260] ss:$16 sps:$4 sm:$0xff]  }
 0x158   :  { %2407 = vmatpush1.bf16.msra.mxu1 %v3739_v56  ;;  %v3835_v56 = vld [vmem:[#allocation7 + $0x268] ss:$16 sps:$4 sm:$0xff]  }
 0x159   :  { %2408 = vmatprep.subr.bf16.mxu1 %v3747_v57  ;;  %v3840_v57 = vld [vmem:[#allocation7 + $0x284] ss:$16 sps:$4 sm:$0xff]  }
 0x15c   :  { %2409 = vmatpush1.bf16.msra.mxu1 %v3745_v58  ;;  %v3843_v58 = vld [vmem:[#allocation7 + $0x28c] ss:$16 sps:$4 sm:$0xff]  }
 0x15d   :  { %2410 = vmatprep.subr.bf16.mxu1 %v3753_v59  ;;  %v3838_v59 = vld [vmem:[#allocation7 + $0x280] ss:$16 sps:$4 sm:$0xff]  }
 0x15e   :  { %v1300_v61 = vpop.f32.mrb[0].mxu1 }
 0x15f   :  { %v1302_v62 = vpop.f32.mrb[1].mxu1  ;;  %v1301_v52 = vadd.f32 %v1300_v61, %v289_v27  ;;  %v3849_v61 = vld [vmem:[#allocation7 + $0x2ac] ss:$16 sps:$4 sm:$0xff]   ;;  %v3880_v27 = vld [vmem:[#allocation7 + $0x360] ss:$16 sps:$4 sm:$0xff]  }
 0x160   :  { %v1304_v63 = vpop.f32.mrb[2].mxu1  ;;  %2411 = vmatpush1.bf16.msra.mxu1 %v3751_v60  ;;  %v1303_v28 = vadd.f32 %v1302_v62, %v293_v8  ;;  %v3841_v60 = vld [vmem:[#allocation7 + $0x288] ss:$16 sps:$4 sm:$0xff]   ;;  %v3844_v62 = vld [vmem:[#allocation7 + $0x2a0] ss:$16 sps:$4 sm:$0xff]  }
 0x161   :  { %v1305_v1 = vpop.f32.mrb[3].mxu1  ;;  %2412 = vmatprep.subr.bf16.mxu1 %v3759_v15  ;;  %v3846_v15 = vld [vmem:[#allocation7 + $0x2a4] ss:$16 sps:$4 sm:$0xff]   ;;  %v3847_v63 = vld [vmem:[#allocation7 + $0x2a8] ss:$16 sps:$4 sm:$0xff]  }
 0x162   :  { %v3855_v1 = vld [vmem:[#allocation7 + $0x2cc] ss:$16 sps:$4 sm:$0xff]   ;;  %v3883_v8 = vld [vmem:[#allocation7 + $0x368] ss:$16 sps:$4 sm:$0xff]  }
 0x164   :  { %2413 = vmatpush1.bf16.msra.mxu1 %v3757_v0  ;;  %v3852_v0 = vld [vmem:[#allocation7 + $0x2c4] ss:$16 sps:$4 sm:$0xff]  }
 0x165   :  { %2414 = vmatprep.subr.bf16.mxu1 %v3765_v2  ;;  %v3850_v2 = vld [vmem:[#allocation7 + $0x2c0] ss:$16 sps:$4 sm:$0xff]  }
 0x168   :  { %2415 = vmatpush1.bf16.msra.mxu1 %v3763_v3  ;;  %v3853_v3 = vld [vmem:[#allocation7 + $0x2c8] ss:$16 sps:$4 sm:$0xff]  }
 0x169   :  { %2416 = vmatprep.subr.bf16.mxu1 %v3771_v4  ;;  %v3858_v4 = vld [vmem:[#allocation7 + $0x2e4] ss:$16 sps:$4 sm:$0xff]  }
 0x16c   :  { %2417 = vmatpush1.bf16.msra.mxu1 %v3769_v5  ;;  %v3861_v5 = vld [vmem:[#allocation7 + $0x2ec] ss:$16 sps:$4 sm:$0xff]  }
 0x16d   :  { %2418 = vmatprep.subr.bf16.mxu1 %v3777_v6  ;;  %v3856_v6 = vld [vmem:[#allocation7 + $0x2e0] ss:$16 sps:$4 sm:$0xff]  }
 0x170   :  { %2419 = vmatpush1.bf16.msra.mxu1 %v3775_v7  ;;  %v3859_v7 = vld [vmem:[#allocation7 + $0x2e8] ss:$16 sps:$4 sm:$0xff]  }
 0x171   :  { %2420 = vmatprep.subr.bf16.mxu1 %v3783_v9  ;;  %v3864_v9 = vld [vmem:[#allocation7 + $0x304] ss:$16 sps:$4 sm:$0xff]  }
 0x174   :  { %2421 = vmatpush1.bf16.msra.mxu1 %v3781_v10  ;;  %v3867_v10 = vld [vmem:[#allocation7 + $0x30c] ss:$16 sps:$4 sm:$0xff]  }
 0x175   :  { %2422 = vmatprep.subr.bf16.mxu1 %v3789_v12  ;;  %v3862_v12 = vld [vmem:[#allocation7 + $0x300] ss:$16 sps:$4 sm:$0xff]  }
 0x178   :  { %2423 = vmatpush1.bf16.msra.mxu1 %v3787_v13  ;;  %v3865_v13 = vld [vmem:[#allocation7 + $0x308] ss:$16 sps:$4 sm:$0xff]  }
 0x179   :  { %2424 = vmatprep.subr.bf16.mxu1 %v3795_v14  ;;  %v3870_v14 = vld [vmem:[#allocation7 + $0x324] ss:$16 sps:$4 sm:$0xff]  }
 0x17c   :  { %2425 = vmatpush1.bf16.msra.mxu1 %v3793_v16  ;;  %v3873_v16 = vld [vmem:[#allocation7 + $0x32c] ss:$16 sps:$4 sm:$0xff]  }
 0x17d   :  { %2426 = vmatprep.subr.bf16.mxu1 %v3801_v17  ;;  %v3868_v17 = vld [vmem:[#allocation7 + $0x320] ss:$16 sps:$4 sm:$0xff]  }
 0x180   :  { %2427 = vmatpush1.bf16.msra.mxu1 %v3799_v18  ;;  %v3871_v18 = vld [vmem:[#allocation7 + $0x328] ss:$16 sps:$4 sm:$0xff]  }
 0x181   :  { %2428 = vmatprep.subr.bf16.mxu1 %v3807_v19  ;;  %v3876_v19 = vld [vmem:[#allocation7 + $0x344] ss:$16 sps:$4 sm:$0xff]  }
 0x184   :  { %2429 = vmatpush1.bf16.msra.mxu1 %v3805_v20  ;;  %v3879_v20 = vld [vmem:[#allocation7 + $0x34c] ss:$16 sps:$4 sm:$0xff]  }
 0x185   :  { %2430 = vmatprep.subr.bf16.mxu1 %v3813_v21  ;;  %v3874_v21 = vld [vmem:[#allocation7 + $0x340] ss:$16 sps:$4 sm:$0xff]  }
 0x188   :  { %2431 = vmatpush1.bf16.msra.mxu1 %v3811_v11  ;;  %v3877_v11 = vld [vmem:[#allocation7 + $0x348] ss:$16 sps:$4 sm:$0xff]  }
 0x189   :  { %2441 = vmatprep.subr.bf16.mxu1 %v3819_v22  ;;  %v3882_v22 = vld [vmem:[#allocation7 + $0x364] ss:$16 sps:$4 sm:$0xff]  }
 0x19f   :  { %v1382_v29 = vpop.f32.mrb[0].mxu0 }
 0x1a0   :  { %v3386_v30 = vadd.f32 %v1382_v29, %v1301_v52  ;;  %v1384_v31 = vpop.f32.mrb[1].mxu0  ;;  %v3888_v52 = vld [vmem:[#allocation7 + $0x384] ss:$16 sps:$4 sm:$0xff]   ;;  %v3886_v29 = vld [vmem:[#allocation7 + $0x380] ss:$16 sps:$4 sm:$0xff]  }
 0x1a1   :  { %v3388_v32 = vadd.f32 %v1384_v31, %v1303_v28  ;;  %v1386_v33 = vpop.f32.mrb[2].mxu0  ;;  %v3891_v28 = vld [vmem:[#allocation7 + $0x38c] ss:$16 sps:$4 sm:$0xff]   ;;  %v3894_v31 = vld [vmem:[#allocation7 + $0x3a4] ss:$16 sps:$4 sm:$0xff]  }
 0x1a2   :  { %vm1512_vm0 = vcmp.gt.f32.partialorder %v3386_v30, 0.0  ;;  %v1516_v34 = vmul.f32 0.01, %v3386_v30  ;;  %v1387_v36 = vpop.f32.mrb[3].mxu0  ;;  %v3892_v33 = vld [vmem:[#allocation7 + $0x3a0] ss:$16 sps:$4 sm:$0xff]  }
 0x1a3   :  { %vm1513_vm1 = vcmp.gt.f32.partialorder %v3388_v32, 0.0  ;;  %v1517_v37 = vmul.f32 0.01, %v3388_v32  ;;  %v3900_v36 = vld [vmem:[#allocation7 + $0x3c4] ss:$16 sps:$4 sm:$0xff]  }
 0x1a4   :  { %v1520_v38 = vsel %vm1512_vm0, %v3386_v30, %v1516_v34  ;;  %v3889_v30 = vld [vmem:[#allocation7 + $0x388] ss:$16 sps:$4 sm:$0xff]  }
 0x1a5   :  { %v1521_v39 = vsel %vm1513_vm1, %v3388_v32, %v1517_v37  ;;  %v1524_v43 = vpack.c.bf16 %v1520_v38, %v1520_v38  ;;  %v3897_v32 = vld [vmem:[#allocation7 + $0x3ac] ss:$16 sps:$4 sm:$0xff]   ;;  %v3895_v34 = vld [vmem:[#allocation7 + $0x3a8] ss:$16 sps:$4 sm:$0xff]   ;;  %v3898_v38 = vld [vmem:[#allocation7 + $0x3c0] ss:$16 sps:$4 sm:$0xff]  }
 0x1a6   :  { %v1525_v40 = vpack.c.bf16 %v1521_v39, %v1521_v39  ;;  %v3903_v37 = vld [vmem:[#allocation7 + $0x3cc] ss:$16 sps:$4 sm:$0xff]   ;;  %v3901_v39 = vld [vmem:[#allocation7 + $0x3c8] ss:$16 sps:$4 sm:$0xff]  }
 0x1a8   :  { %2350 = vmatprep.mubr.bf16.mxu0 %v1525_v40  ;;  %2432 = vmatprep.mubr.bf16.mxu1 %v1525_v40  ;;  %v3906_v40 = vld [vmem:[#allocation7 + $0x3e4] ss:$16 sps:$4 sm:$0xff]  }
 0x1a9   :  { %2351 = vmatmul.mubr.bf16.vlgmr.msra.gmra.mrb[4].mxu0 %v1524_v43  ;;  %2433 = vmatmul.mubr.bf16.vlgmr.msra.gmra.mrb[8].mxu1 %v1524_v43  ;;  %v3907_v43 = vld [vmem:[#allocation7 + $0x3e8] ss:$16 sps:$4 sm:$0xff]  }
 0x1aa   :  { %2360 = vmatpush1.bf16.msra.mxu0 %v3814_v41  ;;  %2442 = vmatpush1.bf16.msra.mxu1 %v3817_v42  ;;  %v3909_v41 = vld [vmem:[#allocation7 + $0x3ec] ss:$16 sps:$4 sm:$0xff]   ;;  %v3904_v42 = vld [vmem:[#allocation7 + $0x3e0] ss:$16 sps:$4 sm:$0xff]  }
 0x1ab   :  { %2361 = vmatprep.subr.bf16.mxu0 %v3822_v44  ;;  %2443 = vmatprep.subr.bf16.mxu1 %v3825_v45  ;;  %v3912_v44 = vld [vmem:[#allocation8 + $0x4] ss:$8 sps:$4 sm:$0xff]   ;;  %v296_v45 = vsub.s32 2, %v4251_v23 }
 0x1ae   :  { %2362 = vmatpush1.bf16.msra.mxu0 %v3820_v46  ;;  %2444 = vmatpush1.bf16.msra.mxu1 %v3823_v47  ;;  %v300_v46 = vsub.s32 3, %v4251_v23  ;;  %v297_v47 = vrot.slane %v4259_v25, %v296_v45 }
 0x1af   :  { %2363 = vmatprep.subr.bf16.mxu0 %v3828_v48  ;;  %2445 = vmatprep.subr.bf16.mxu1 %v3831_v49 }
 0x1b0   :  { %v301_v48 = vrot.slane %v4259_v25, %v300_v46  ;;  %v3913_v25 = vld [vmem:[#allocation8 + $0x10] ss:$8 sps:$4 sm:$0xff]  }
 0x1b2   :  { %2364 = vmatpush1.bf16.msra.mxu0 %v3826_v50  ;;  %2446 = vmatpush1.bf16.msra.mxu1 %v3829_v51 }
 0x1b3   :  { %2365 = vmatprep.subr.bf16.mxu0 %v3834_v53  ;;  %2447 = vmatprep.subr.bf16.mxu1 %v3837_v54 }
 0x1b6   :  { %2366 = vmatpush1.bf16.msra.mxu0 %v3832_v55  ;;  %2448 = vmatpush1.bf16.msra.mxu1 %v3835_v56 }
 0x1b7   :  { %2367 = vmatprep.subr.bf16.mxu0 %v3840_v57  ;;  %2449 = vmatprep.subr.bf16.mxu1 %v3843_v58 }
 0x1ba   :  { %2368 = vmatpush1.bf16.msra.mxu0 %v3838_v59  ;;  %2450 = vmatpush1.bf16.msra.mxu1 %v3841_v60 }
 0x1bb   :  { %2369 = vmatprep.subr.bf16.mxu0 %v3846_v15  ;;  %2451 = vmatprep.subr.bf16.mxu1 %v3849_v61  ;;  %v3910_v15 = vld [vmem:[#allocation8] ss:$8 sps:$4 sm:$0xff]  }
 0x1be   :  { %2370 = vmatpush1.bf16.msra.mxu0 %v3844_v62  ;;  %2452 = vmatpush1.bf16.msra.mxu1 %v3847_v63  ;;  %v3915_v62 = vld [vmem:[#allocation8 + $0x14] ss:$8 sps:$4 sm:$0xff]   ;;  %v3918_v63 = vld [vmem:[#allocation8 + $0x24] ss:$8 sps:$4 sm:$0xff]  }
 0x1bf   :  { %2371 = vmatprep.subr.bf16.mxu0 %v3852_v0  ;;  %2453 = vmatprep.subr.bf16.mxu1 %v3855_v1  ;;  %v3916_v0 = vld [vmem:[#allocation8 + $0x20] ss:$8 sps:$4 sm:$0xff]   ;;  %v3921_v1 = vld [vmem:[#allocation8 + $0x34] ss:$8 sps:$4 sm:$0xff]  }
 0x1c2   :  { %2372 = vmatpush1.bf16.msra.mxu0 %v3850_v2  ;;  %2454 = vmatpush1.bf16.msra.mxu1 %v3853_v3  ;;  %v3919_v2 = vld [vmem:[#allocation8 + $0x30] ss:$8 sps:$4 sm:$0xff]   ;;  %v3924_v3 = vld [vmem:[#allocation8 + $0x44] ss:$8 sps:$4 sm:$0xff]  }
 0x1c3   :  { %2373 = vmatprep.subr.bf16.mxu0 %v3858_v4  ;;  %2455 = vmatprep.subr.bf16.mxu1 %v3861_v5  ;;  %v3922_v4 = vld [vmem:[#allocation8 + $0x40] ss:$8 sps:$4 sm:$0xff]   ;;  %v3927_v5 = vld [vmem:[#allocation8 + $0x54] ss:$8 sps:$4 sm:$0xff]  }
 0x1c6   :  { %2374 = vmatpush1.bf16.msra.mxu0 %v3856_v6  ;;  %2456 = vmatpush1.bf16.msra.mxu1 %v3859_v7  ;;  %v3925_v6 = vld [vmem:[#allocation8 + $0x50] ss:$8 sps:$4 sm:$0xff]   ;;  %v3930_v7 = vld [vmem:[#allocation8 + $0x64] ss:$8 sps:$4 sm:$0xff]  }
 0x1c7   :  { %2375 = vmatprep.subr.bf16.mxu0 %v3864_v9  ;;  %2457 = vmatprep.subr.bf16.mxu1 %v3867_v10  ;;  %v3928_v9 = vld [vmem:[#allocation8 + $0x60] ss:$8 sps:$4 sm:$0xff]   ;;  %v3933_v10 = vld [vmem:[#allocation8 + $0x74] ss:$8 sps:$4 sm:$0xff]  }
 0x1ca   :  { %2376 = vmatpush1.bf16.msra.mxu0 %v3862_v12  ;;  %2458 = vmatpush1.bf16.msra.mxu1 %v3865_v13  ;;  %v3931_v12 = vld [vmem:[#allocation8 + $0x70] ss:$8 sps:$4 sm:$0xff]   ;;  %v3936_v13 = vld [vmem:[#allocation8 + $0x84] ss:$8 sps:$4 sm:$0xff]  }
 0x1cb   :  { %2377 = vmatprep.subr.bf16.mxu0 %v3870_v14  ;;  %2459 = vmatprep.subr.bf16.mxu1 %v3873_v16  ;;  %v3934_v14 = vld [vmem:[#allocation8 + $0x80] ss:$8 sps:$4 sm:$0xff]   ;;  %v3939_v16 = vld [vmem:[#allocation8 + $0x94] ss:$8 sps:$4 sm:$0xff]  }
 0x1ce   :  { %2378 = vmatpush1.bf16.msra.mxu0 %v3868_v17  ;;  %2460 = vmatpush1.bf16.msra.mxu1 %v3871_v18  ;;  %v3937_v17 = vld [vmem:[#allocation8 + $0x90] ss:$8 sps:$4 sm:$0xff]   ;;  %v3942_v18 = vld [vmem:[#allocation8 + $0xa4] ss:$8 sps:$4 sm:$0xff]  }
 0x1cf   :  { %2379 = vmatprep.subr.bf16.mxu0 %v3876_v19  ;;  %2461 = vmatprep.subr.bf16.mxu1 %v3879_v20  ;;  %v3940_v19 = vld [vmem:[#allocation8 + $0xa0] ss:$8 sps:$4 sm:$0xff]   ;;  %v3945_v20 = vld [vmem:[#allocation8 + $0xb4] ss:$8 sps:$4 sm:$0xff]  }
 0x1d2   :  { %2380 = vmatpush1.bf16.msra.mxu0 %v3874_v21  ;;  %2462 = vmatpush1.bf16.msra.mxu1 %v3877_v11  ;;  %v3943_v21 = vld [vmem:[#allocation8 + $0xb0] ss:$8 sps:$4 sm:$0xff]   ;;  %v3948_v11 = vld [vmem:[#allocation8 + $0xc4] ss:$8 sps:$4 sm:$0xff]  }
 0x1d3   :  { %2381 = vmatprep.subr.bf16.mxu0 %v3882_v22  ;;  %2463 = vmatprep.subr.bf16.mxu1 %v3885_v35  ;;  %v3946_v22 = vld [vmem:[#allocation8 + $0xc0] ss:$8 sps:$4 sm:$0xff]   ;;  %v3951_v35 = vld [vmem:[#allocation8 + $0xd4] ss:$8 sps:$4 sm:$0xff]  }
 0x1d6   :  { %2382 = vmatpush1.bf16.msra.mxu0 %v3880_v27  ;;  %2464 = vmatpush1.bf16.msra.mxu1 %v3883_v8  ;;  %v3949_v27 = vld [vmem:[#allocation8 + $0xd0] ss:$8 sps:$4 sm:$0xff]   ;;  %v3954_v8 = vld [vmem:[#allocation8 + $0xe4] ss:$8 sps:$4 sm:$0xff]  }
 0x1d7   :  { %2383 = vmatprep.subr.bf16.mxu0 %v3888_v52  ;;  %2465 = vmatprep.subr.bf16.mxu1 %v3891_v28  ;;  %v3952_v52 = vld [vmem:[#allocation8 + $0xe0] ss:$8 sps:$4 sm:$0xff]   ;;  %v3957_v28 = vld [vmem:[#allocation8 + $0xf4] ss:$8 sps:$4 sm:$0xff]  }
 0x1da   :  { %2384 = vmatpush1.bf16.msra.mxu0 %v3886_v29  ;;  %2466 = vmatpush1.bf16.msra.mxu1 %v3889_v30  ;;  %v3955_v29 = vld [vmem:[#allocation8 + $0xf0] ss:$8 sps:$4 sm:$0xff]   ;;  %v3960_v30 = vld [vmem:[#allocation8 + $0x104] ss:$8 sps:$4 sm:$0xff]  }
 0x1db   :  { %2385 = vmatprep.subr.bf16.mxu0 %v3894_v31  ;;  %2467 = vmatprep.subr.bf16.mxu1 %v3897_v32  ;;  %v4279_v31 = vld [vmem:[%s4315_s4] sm:$0xf] }
 0x1dc   :  { %v1661_v32 = vrot.slane %v4279_v31, %v4254_v24 }
 0x1de   :  { %2386 = vmatpush1.bf16.msra.mxu0 %v3892_v33  ;;  %2468 = vmatpush1.bf16.msra.mxu1 %v3895_v34  ;;  %v1665_v33 = vrot.slane %v4279_v31, %v4262_v26  ;;  %v1673_v34 = vrot.slane %v4279_v31, %v300_v46 }
 0x1df   :  { %2387 = vmatprep.subr.bf16.mxu0 %v3900_v36  ;;  %2469 = vmatprep.subr.bf16.mxu1 %v3903_v37 }
 0x1e2   :  { %2388 = vmatpush1.bf16.msra.mxu0 %v3898_v38  ;;  %2470 = vmatpush1.bf16.msra.mxu1 %v3901_v39 }
 0x1e3   :  { %2389 = vmatprep.subr.bf16.mxu0 %v3906_v40  ;;  %2471 = vmatprep.subr.bf16.mxu1 %v3909_v41 }
 0x1e6   :  { %2390 = vmatpush1.bf16.msra.mxu0 %v3904_v42  ;;  %2472 = vmatpush1.bf16.msra.mxu1 %v3907_v43 }
 0x1e7   :  { %2894 = vmatprep.subr.bf16.mxu0 %v3912_v44 }
 0x21e   :  { %v1505_v49 = vpop.f32.mrb[4].mxu1 }
 0x21f   :  { %v3389_v50 = vadd.f32 %v1505_v49, %v297_v47  ;;  %v1507_v51 = vpop.f32.mrb[5].mxu1 }
 0x220   :  { %v3390_v53 = vadd.f32 %v1507_v51, %v301_v48  ;;  %v1509_v54 = vpop.f32.mrb[6].mxu1 }
 0x221   :  { %vm1514_vm2 = vcmp.gt.f32.partialorder %v3389_v50, 0.0  ;;  %v1518_v55 = vmul.f32 0.01, %v3389_v50  ;;  %v1510_v56 = vpop.f32.mrb[7].mxu1 }
 0x222   :  { %vm1515_vm3 = vcmp.gt.f32.partialorder %v3390_v53, 0.0  ;;  %v1519_v57 = vmul.f32 0.01, %v3390_v53  ;;  %v3958_v56 = vld [vmem:[#allocation8 + $0x100] ss:$8 sps:$4 sm:$0xff]  }
 0x223   :  { %v1522_v58 = vsel %vm1514_vm2, %v3389_v50, %v1518_v55 }
 0x224   :  { %v1523_v59 = vsel %vm1515_vm3, %v3390_v53, %v1519_v57  ;;  %v1526_v61 = vpack.c.bf16 %v1522_v58, %v1522_v58  ;;  %v3963_v58 = vld [vmem:[#allocation8 + $0x114] ss:$8 sps:$4 sm:$0xff]  }
 0x225   :  { %v1527_v60 = vpack.c.bf16 %v1523_v59, %v1523_v59 }
 0x227   :  { %2391 = vmatprep.mubr.bf16.mxu0 %v1527_v60  ;;  %2473 = vmatprep.mubr.bf16.mxu1 %v1527_v60  ;;  %v3961_v60 = vld [vmem:[#allocation8 + $0x110] ss:$8 sps:$4 sm:$0xff]  }
 0x228   :  { %2392 = vmatmul.mubr.bf16.vlgmr.msra.gmra.mrb[4].mxu0 %v1526_v61  ;;  %2474 = vmatmul.mubr.bf16.vlgmr.msra.gmra.mrb[8].mxu1 %v1526_v61  ;;  %v3964_v61 = vld [vmem:[#allocation8 + $0x120] ss:$8 sps:$4 sm:$0xff]  }
 0x229   :  { %2895 = vmatpush1.bf16.msra.mxu0 %v3910_v15  ;;  %v3966_v15 = vld [vmem:[#allocation8 + $0x124] ss:$8 sps:$4 sm:$0xff]  }
 0x22a   :  { %2896 = vmatprep.subr.bf16.mxu0 %v3915_v62  ;;  %v3969_v62 = vld [vmem:[#allocation8 + $0x134] ss:$8 sps:$4 sm:$0xff]  }
 0x22d   :  { %2897 = vmatpush1.bf16.msra.mxu0 %v3913_v25  ;;  %v3967_v25 = vld [vmem:[#allocation8 + $0x130] ss:$8 sps:$4 sm:$0xff]  }
 0x22e   :  { %2898 = vmatprep.subr.bf16.mxu0 %v3918_v63  ;;  %v3972_v63 = vld [vmem:[#allocation8 + $0x144] ss:$8 sps:$4 sm:$0xff]  }
 0x231   :  { %2899 = vmatpush1.bf16.msra.mxu0 %v3916_v0  ;;  %v3970_v0 = vld [vmem:[#allocation8 + $0x140] ss:$8 sps:$4 sm:$0xff]  }
 0x232   :  { %2900 = vmatprep.subr.bf16.mxu0 %v3921_v1  ;;  %v3975_v1 = vld [vmem:[#allocation8 + $0x154] ss:$8 sps:$4 sm:$0xff]  }
 0x235   :  { %2901 = vmatpush1.bf16.msra.mxu0 %v3919_v2  ;;  %v3973_v2 = vld [vmem:[#allocation8 + $0x150] ss:$8 sps:$4 sm:$0xff]  }
 0x236   :  { %2902 = vmatprep.subr.bf16.mxu0 %v3924_v3  ;;  %v3978_v3 = vld [vmem:[#allocation8 + $0x164] ss:$8 sps:$4 sm:$0xff]  }
 0x239   :  { %2903 = vmatpush1.bf16.msra.mxu0 %v3922_v4  ;;  %v3976_v4 = vld [vmem:[#allocation8 + $0x160] ss:$8 sps:$4 sm:$0xff]  }
 0x23a   :  { %2904 = vmatprep.subr.bf16.mxu0 %v3927_v5  ;;  %v3981_v5 = vld [vmem:[#allocation8 + $0x174] ss:$8 sps:$4 sm:$0xff]  }
 0x23d   :  { %2905 = vmatpush1.bf16.msra.mxu0 %v3925_v6  ;;  %v3979_v6 = vld [vmem:[#allocation8 + $0x170] ss:$8 sps:$4 sm:$0xff]  }
 0x23e   :  { %2906 = vmatprep.subr.bf16.mxu0 %v3930_v7  ;;  %v3984_v7 = vld [vmem:[#allocation8 + $0x184] ss:$8 sps:$4 sm:$0xff]  }
 0x241   :  { %2907 = vmatpush1.bf16.msra.mxu0 %v3928_v9  ;;  %v3982_v9 = vld [vmem:[#allocation8 + $0x180] ss:$8 sps:$4 sm:$0xff]  }
 0x242   :  { %2908 = vmatprep.subr.bf16.mxu0 %v3933_v10  ;;  %v3987_v10 = vld [vmem:[#allocation8 + $0x194] ss:$8 sps:$4 sm:$0xff]  }
 0x245   :  { %2909 = vmatpush1.bf16.msra.mxu0 %v3931_v12  ;;  %v3985_v12 = vld [vmem:[#allocation8 + $0x190] ss:$8 sps:$4 sm:$0xff]  }
 0x246   :  { %2910 = vmatprep.subr.bf16.mxu0 %v3936_v13  ;;  %v3990_v13 = vld [vmem:[#allocation8 + $0x1a4] ss:$8 sps:$4 sm:$0xff]  }
 0x249   :  { %2911 = vmatpush1.bf16.msra.mxu0 %v3934_v14  ;;  %v3988_v14 = vld [vmem:[#allocation8 + $0x1a0] ss:$8 sps:$4 sm:$0xff]  }
 0x24a   :  { %2912 = vmatprep.subr.bf16.mxu0 %v3939_v16  ;;  %v3993_v16 = vld [vmem:[#allocation8 + $0x1b4] ss:$8 sps:$4 sm:$0xff]  }
 0x24d   :  { %2913 = vmatpush1.bf16.msra.mxu0 %v3937_v17  ;;  %v3991_v17 = vld [vmem:[#allocation8 + $0x1b0] ss:$8 sps:$4 sm:$0xff]  }
 0x24e   :  { %2914 = vmatprep.subr.bf16.mxu0 %v3942_v18  ;;  %v3996_v18 = vld [vmem:[#allocation8 + $0x1c4] ss:$8 sps:$4 sm:$0xff]  }
 0x251   :  { %2915 = vmatpush1.bf16.msra.mxu0 %v3940_v19  ;;  %v3994_v19 = vld [vmem:[#allocation8 + $0x1c0] ss:$8 sps:$4 sm:$0xff]  }
 0x252   :  { %2916 = vmatprep.subr.bf16.mxu0 %v3945_v20  ;;  %v3999_v20 = vld [vmem:[#allocation8 + $0x1d4] ss:$8 sps:$4 sm:$0xff]  }
 0x255   :  { %2917 = vmatpush1.bf16.msra.mxu0 %v3943_v21  ;;  %v1669_v21 = vrot.slane %v4279_v31, %v296_v45  ;;  %v2562_v45 = vld [vmem:[%s4317_s6] sm:$0x3]  ;;  %s4094_s6 = scalar_lea.vmem %s2991_s30, 256 }
 0x256   :  { %2918 = vmatprep.subr.bf16.mxu0 %v3948_v11  ;;  %v3997_v11 = vld [vmem:[#allocation8 + $0x1d0] ss:$8 sps:$4 sm:$0xff]   ;;  %v2571_v31 = vrot.slane %v2562_v45, %v4262_v26  ;;  %p4095_p4 = scmp.ne.s32.totalorder %s2991_s30, %s4094_s6  ;;  %p4100_p6 = scmp.lt.s32.totalorder %s4094_s6, %s4094_s6 }
 0x258   :  { %p4101_p7 = por %p4100_p6, %p4099_p5 }
 0x259   :  { %2919 = vmatpush1.bf16.msra.mxu0 %v3946_v22  ;;  %v4002_v22 = vld [vmem:[#allocation8 + $0x1e4] ss:$8 sps:$4 sm:$0xff]  }
 0x25a   :  { %2920 = vmatprep.subr.bf16.mxu0 %v3951_v35  ;;  %p4102_p8 = pnand %p4101_p7, %p4095_p4 }
 0x25d   :  { %2921 = vmatpush1.bf16.msra.mxu0 %v3949_v27  ;;  %v4000_v27 = vld [vmem:[#allocation8 + $0x1e0] ss:$8 sps:$4 sm:$0xff]  }
 0x25e   :  { %2922 = vmatprep.subr.bf16.mxu0 %v3954_v8  ;;  %v4005_v8 = vld [vmem:[#allocation8 + $0x1f4] ss:$8 sps:$4 sm:$0xff]  }
 0x261   :  { %2923 = vmatpush1.bf16.msra.mxu0 %v3952_v52 }
 0x262   :  { %2924 = vmatprep.subr.bf16.mxu0 %v3957_v28  ;;  %v4003_v28 = vld [vmem:[#allocation8 + $0x1f0] ss:$8 sps:$4 sm:$0xff]  }
 0x265   :  { %2925 = vmatpush1.bf16.msra.mxu0 %v3955_v29 }
 0x266   :  { %2935 = vmatprep.subr.bf16.mxu0 %v3960_v30  ;;  %v2567_v30 = vrot.slane %v2562_v45, %v4254_v24 }
 0x2fb   :  { %v2393_v36 = vpop.f32.mrb[4].mxu0  ;;  %v4288_v37 = vpop.f32.mrb[8].mxu1 }
 0x2fc   :  { %v3391_v38 = vadd.f32 %v2393_v36, %v1661_v32  ;;  %v2395_v39 = vpop.f32.mrb[5].mxu0  ;;  %v2477_v40 = vpop.f32.mrb[9].mxu1  ;;  %v3393_v35 = vadd.f32 %v4288_v37, %v1669_v21 }
 0x2fd   :  { %v3392_v41 = vadd.f32 %v2395_v39, %v1665_v33  ;;  %v3394_v42 = vadd.f32 %v2477_v40, %v1673_v34  ;;  %v2397_v43 = vpop.f32.mrb[6].mxu0  ;;  %v2479_v44 = vpop.f32.mrb[10].mxu1 }
 0x2fe   :  { %vm2482_vm4 = vcmp.gt.f32.partialorder %v3391_v38, 0.0  ;;  %v2486_v47 = vmul.f32 0.01, %v3391_v38  ;;  %v2398_v51 = vpop.f32.mrb[7].mxu0  ;;  %v2480_v53 = vpop.f32.mrb[11].mxu1  ;;  %vm2484_vm7 = vcmp.gt.f32.partialorder %v3393_v35, 0.0 }
 0x2ff   :  { %vm2483_vm5 = vcmp.gt.f32.partialorder %v3392_v41, 0.0  ;;  %v2487_v48 = vmul.f32 0.01, %v3392_v41  ;;  %vm2485_vm6 = vcmp.gt.f32.partialorder %v3394_v42, 0.0  ;;  %v2489_v49 = vmul.f32 0.01, %v3394_v42 }
 0x300   :  { %v2490_v50 = vsel %vm2482_vm4, %v3391_v38, %v2486_v47  ;;  %v2488_v52 = vmul.f32 0.01, %v3393_v35 }
 0x301   :  { %v2491_v46 = vsel %vm2483_vm5, %v3392_v41, %v2487_v48  ;;  %v2493_v54 = vsel %vm2485_vm6, %v3394_v42, %v2489_v49  ;;  %v2494_v57 = vpack.c.bf16 %v2490_v50, %v2490_v50 }
 0x302   :  { %v2495_v55 = vpack.c.bf16 %v2491_v46, %v2491_v46  ;;  %v2497_v59 = vpack.c.bf16 %v2493_v54, %v2493_v54  ;;  %v2492_v29 = vsel %vm2484_vm7, %v3393_v35, %v2488_v52 }
 0x303   :  { %v2496_v23 = vpack.c.bf16 %v2492_v29, %v2492_v29 }
 0x304   :  { %2926 = vmatprep.mubr.bf16.mxu0 %v2495_v55 }
 0x305   :  { %2927 = vmatmul.mubr.bf16.vlgmr.msra.gmra.mrb[8].mxu0 %v2494_v57 }
 0x306   :  { %2936 = vmatpush1.bf16.msra.mxu0 %v3958_v56  ;;  %2967 = vmatprep.mubr.bf16.mxu0 %v2497_v59 }
 0x307   :  { %2937 = vmatprep.subr.bf16.mxu0 %v3963_v58 }
 0x30a   :  { %2938 = vmatpush1.bf16.msra.mxu0 %v3961_v60 }
 0x30b   :  { %2939 = vmatprep.subr.bf16.mxu0 %v3966_v15 }
 0x30e   :  { %2940 = vmatpush1.bf16.msra.mxu0 %v3964_v61 }
 0x30f   :  { %2941 = vmatprep.subr.bf16.mxu0 %v3969_v62 }
 0x312   :  { %2942 = vmatpush1.bf16.msra.mxu0 %v3967_v25 }
 0x313   :  { %2943 = vmatprep.subr.bf16.mxu0 %v3972_v63 }
 0x316   :  { %2944 = vmatpush1.bf16.msra.mxu0 %v3970_v0 }
 0x317   :  { %2945 = vmatprep.subr.bf16.mxu0 %v3975_v1 }
 0x31a   :  { %2946 = vmatpush1.bf16.msra.mxu0 %v3973_v2 }
 0x31b   :  { %2947 = vmatprep.subr.bf16.mxu0 %v3978_v3 }
 0x31e   :  { %2948 = vmatpush1.bf16.msra.mxu0 %v3976_v4 }
 0x31f   :  { %2949 = vmatprep.subr.bf16.mxu0 %v3981_v5 }
 0x322   :  { %2950 = vmatpush1.bf16.msra.mxu0 %v3979_v6 }
 0x323   :  { %2951 = vmatprep.subr.bf16.mxu0 %v3984_v7 }
 0x326   :  { %2952 = vmatpush1.bf16.msra.mxu0 %v3982_v9 }
 0x327   :  { %2953 = vmatprep.subr.bf16.mxu0 %v3987_v10 }
 0x32a   :  { %2954 = vmatpush1.bf16.msra.mxu0 %v3985_v12 }
 0x32b   :  { %2955 = vmatprep.subr.bf16.mxu0 %v3990_v13 }
 0x32e   :  { %2956 = vmatpush1.bf16.msra.mxu0 %v3988_v14 }
 0x32f   :  { %2957 = vmatprep.subr.bf16.mxu0 %v3993_v16 }
 0x332   :  { %2958 = vmatpush1.bf16.msra.mxu0 %v3991_v17 }
 0x333   :  { %2959 = vmatprep.subr.bf16.mxu0 %v3996_v18 }
 0x336   :  { %2960 = vmatpush1.bf16.msra.mxu0 %v3994_v19 }
 0x337   :  { %2961 = vmatprep.subr.bf16.mxu0 %v3999_v20 }
 0x33a   :  { %2962 = vmatpush1.bf16.msra.mxu0 %v3997_v11 }
 0x33b   :  { %2963 = vmatprep.subr.bf16.mxu0 %v4002_v22 }
 0x33e   :  { %2964 = vmatpush1.bf16.msra.mxu0 %v4000_v27 }
 0x33f   :  { %2965 = vmatprep.subr.bf16.mxu0 %v4005_v8 }
 0x342   :  { %2966 = vmatpush1.bf16.msra.mxu0 %v4003_v28 }
 0x345   :  { %2968 = vmatmul.mubr.bf16.vlgmr.msra.gmra.mrb[8].mxu0 %v2496_v23 }
 0x418   :  { %v2969_v32 = vpop.f32.mrb[8].mxu0 }
 0x419   :  { %v3395_v33 = vadd.f32 %v2969_v32, %v2567_v30  ;;  %v2971_v34 = vpop.f32.mrb[9].mxu0 }
 0x41a   :  { %v3396_v36 = vadd.f32 %v2971_v34, %v2571_v31  ;;  %v2973_v37 = vpop.f32.mrb[10].mxu0 }
 0x41b   :  { %vm2976_vm8 = vcmp.gt.f32.partialorder %v3395_v33, 0.0  ;;  %v2978_v38 = vmul.f32 0.01, %v3395_v33  ;;  %v2974_v39 = vpop.f32.mrb[11].mxu0 }
 0x41c   :  { %vm2977_vm9 = vcmp.gt.f32.partialorder %v3396_v36, 0.0  ;;  %v2979_v40 = vmul.f32 0.01, %v3396_v36 }
 0x41d   :  { %v2980_v41 = vsel %vm2976_vm8, %v3395_v33, %v2978_v38 }
 0x41e   :  { %v2981_v42 = vsel %vm2977_vm9, %v3396_v36, %v2979_v40  ;;  %2982 = vst [vmem:[#allocation10] sm:$0xff] %v2980_v41 }
 0x41f   :  { %2983 = vst [vmem:[#allocation10 + $0x8] sm:$0xff] %v2981_v42 }
 0x420   :  { %4105 = shalt.err (!%p4102_p8)
}
 0x421   :  { %s4106_s10 = scalar_lea.hbm %s4318_s7, 256 }
 0x422   :  { %p4107_p9 = scmp.ne.s32.totalorder %s4318_s7, %s4106_s10  ;;  %p4110_p10 = scmp.lt.u32.totalorder %s4106_s10, %s4318_s7 }
 0x424   :  { %p4112_p11 = pnand %p4110_p10, %p4107_p9 }
 0x426   :  { %4115 = shalt.err (!%p4112_p11)
}
 0x427   :  { %2993 = dma.vmem_to_hbm [thread:$0]  %s2991_s30, 256, %s4318_s7, [#allocation4]  }
 0x428   :  { %4122 = dma.done.wait [#allocation4], 256  }
 0x429   :  { %4123 = vsyncadd [#allocation4], 4294967040 }
 0x42a   :  { %2997 = vsyncpa [#allocation3], 1 }
 0x42b   :  { %2998 = vsyncpa [#allocation6], 1 }
 0x42c   :  { %2999 = vsyncpa [#allocation9], 1 }
 0x42d   :  { %3000 = vsyncpa [#allocation4], 1 }

</bundles_post_ra>
